<compile_context>
chip_gen: v7x
topology: tpu7x:2x2x1
jax: 0.10.0
libtpu: 0.0.40
codegen_flags: <defaults>
</compile_context>

<pallas_src>
import math

import jax
import jax.numpy as jnp
from jax import lax
from jax.experimental import pallas as pl
from jax.experimental.pallas import tpu as pltpu


def _make_mhsa_kernel(S, D, num_heads, head_size, q_tile, kv_tile,
                      compute_dtype, approx_recip):
    H, hs, TQ, TKV = num_heads, head_size, q_tile, kv_tile
    scale = 1.0 / math.sqrt(hs)
    nkv = S // TKV
    nproj = S // TQ   # projection chunk = query tile (both divide S)

    def kernel(tile_active_ref,                                          # scalar prefetch
               x_ref, mask_ref, wqkv_ref, bqkv_ref, wo3_ref, bo_ref,     # inputs
               o_ref,                                                    # output
               q_sc, k_sc, v_sc, m_sc, l_sc, acc_sc):                    # scratch
        b = pl.program_id(0)
        qi = pl.program_id(1)
        kv = pl.program_id(2)

        # ---- once per batch row: fused QKV projection into head-major scratch ----
        @pl.when((qi == 0) & (kv == 0))
        def _project():
            wqkv = wqkv_ref[...]                       # (D, 3D) compute dtype (hoisted)
            bqkv = bqkv_ref[...]                       # (1, 3D) f32

            def body(i, carry):
                off = pl.multiple_of(i * TQ, TQ)
                xc = x_ref[0, pl.ds(off, TQ), :]       # (TQ, D)
                qkv = jnp.dot(xc, wqkv,
                              preferred_element_type=jnp.float32) + bqkv  # (TQ, 3D) f32
                for h in range(H):
                    lo = h * hs
                    # fold 1/sqrt(hs) into Q in f32, before the narrow cast
                    q_sc[h, pl.ds(off, TQ), :] = (
                        qkv[:, lo:lo + hs] * scale).astype(compute_dtype)
                    k_sc[h, pl.ds(off, TQ), :] = (
                        qkv[:, D + lo:D + lo + hs]).astype(compute_dtype)
                    v_sc[h, pl.ds(off, TQ), :] = (
                        qkv[:, 2 * D + lo:2 * D + lo + hs]).astype(compute_dtype)
                return carry

            lax.fori_loop(0, nproj, body, 0)

        # ---- per query tile: reset online-softmax state ----
        @pl.when(kv == 0)
        def _init():
            m_sc[...] = jnp.full(m_sc.shape, -jnp.inf, m_sc.dtype)
            l_sc[...] = jnp.zeros(l_sc.shape, l_sc.dtype)
            acc_sc[...] = jnp.zeros(acc_sc.shape, acc_sc.dtype)

        qoff = pl.multiple_of(qi * TQ, TQ)
        koff = pl.multiple_of(kv * TKV, TKV)

        # ---- per (q, kv) tile: scores + online softmax (skip fully-masked tiles) ----
        @pl.when(tile_active_ref[b, kv] != 0)
        def _update():
            q_t = q_sc[:, pl.ds(qoff, TQ), :]          # (H, TQ, hs)
            k_t = k_sc[:, pl.ds(koff, TKV), :]         # (H, TKV, hs)
            v_t = v_sc[:, pl.ds(koff, TKV), :]         # (H, TKV, hs)

            s = jnp.einsum('hqc,hkc->hqk', q_t, k_t,
                           preferred_element_type=jnp.float32)      # (H, TQ, TKV) f32
            # additive key-padding mask, identical to PyTorch: score += (1-mask)*-1e9
            neg = (1.0 - mask_ref[0]) * (-1e9)         # (1, TKV) f32
            s = s + neg                                # broadcast over heads / queries

            m_prev = m_sc[...]                         # (H, TQ, 1)
            m_new = jnp.maximum(m_prev, jnp.max(s, axis=-1, keepdims=True))
            alpha = jnp.exp(m_prev - m_new)
            # TODO(synk): bf16 exp would ~double EUP throughput on v6e/v7x; kept f32
            # here for v5e compatibility and tight numerical parity.
            p = jnp.exp(s - m_new)                     # f32 softmax math
            l_sc[...] = alpha * l_sc[...] + jnp.sum(p, axis=-1, keepdims=True)
            acc_sc[...] = alpha * acc_sc[...] + jnp.einsum(
                'hqk,hkc->hqc', p.astype(compute_dtype), v_t,
                preferred_element_type=jnp.float32)
            m_sc[...] = m_new

        # ---- last KV tile: normalize + fused output projection for this q tile ----
        @pl.when(kv == nkv - 1)
        def _finalize():
            inv_l = pl.reciprocal(l_sc[...], approx=approx_recip)   # (H, TQ, 1) on EUP
            att = (acc_sc[...] * inv_l).astype(compute_dtype)       # (H, TQ, hs)
            out_h = jnp.einsum('hqc,hcd->hqd', att, wo3_ref[...],
                               preferred_element_type=jnp.float32)  # (H, TQ, D)
            out = jnp.sum(out_h, axis=0) + bo_ref[...]              # (TQ, D)
            o_ref[0] = out.astype(o_ref.dtype)

    return kernel


def _pick_tile(S, candidates):
    for t in candidates:
        if S % t == 0:
            return t
    return S


def _padded_bytes(shape, itemsize):
    """Rough Mosaic-padded VMEM footprint (lane->128, sublane->8)."""
    s = list(shape)
    if len(s) >= 1:
        s[-1] = -(-s[-1] // 128) * 128
    if len(s) >= 2:
        s[-2] = -(-s[-2] // 8) * 8
    n = 1
    for d in s:
        n *= d
    return n * itemsize


def multi_head_self_attention(x, key_mask, params, num_heads, *,
                              q_tile=None, kv_tile=None,
                              compute_dtype=jnp.bfloat16,
                              approx_reciprocal=True):
    """Pallas TPU MultiHeadSelfAttention (CMCAD).

    x:        (B, S, D) activations.
    key_mask: (B, S) with 1 = key attended, 0 = masked (CMCAD's enc_mask; equivalent
              to _make_attn_mask(key_mask) expanded to (B, S, S)), or None.
    params:   dict 'q','k','v','o' -> (W_t, b) with W_t = W.T, so the kernel computes
              x @ W_t + b exactly like torch.nn.Linear.
    Returns (B, S, D) in x.dtype.
    """
    B, S, D = x.shape
    assert D % num_heads == 0, "d_model must be divisible by the number of heads"
    hs = D // num_heads

    if kv_tile is None:
        kv_tile = _pick_tile(S, (512, 256, 128))
    if q_tile is None:
        q_tile = _pick_tile(S, (256, 128))
    assert S % kv_tile == 0 and S % q_tile == 0
    nkv = S // kv_tile
    nq = S // q_tile

    if key_mask is None:
        key_mask = jnp.ones((B, S), jnp.float32)
    key_mask = key_mask.astype(jnp.float32)

    wq_t, bq = params["q"]
    wk_t, bk = params["k"]
    wv_t, bv = params["v"]
    wo_t, bo = params["o"]

    # Host-side weight prep: fused QKV weight/bias, head-major output projection.
    wqkv = jnp.concatenate([wq_t, wk_t, wv_t], axis=1).astype(compute_dtype)   # (D, 3D)
    bqkv = jnp.concatenate([bq, bk, bv], axis=1).astype(jnp.float32)           # (1, 3D)
    wo3 = wo_t.reshape(num_heads, hs, D).astype(compute_dtype)                 # (H, hs, D)
    bo_f = bo.astype(jnp.float32)                                              # (1, D)

    x_c = x.astype(compute_dtype)
    mask3 = key_mask.reshape(B, 1, S)   # streamed as (1, 1, TKV) blocks per KV step

    # Tile-skip table: process a KV tile iff it contains a valid key, or the whole
    # row is masked (so fully-masked rows keep PyTorch's uniform-attention result).
    valid = key_mask != 0
    tile_any = valid.reshape(B, nkv, kv_tile).any(axis=-1)                     # (B, nkv)
    row_any = valid.any(axis=-1, keepdims=True)                                # (B, 1)
    tile_active = (tile_any | jnp.logical_not(row_any)).astype(jnp.int32)      # (B, nkv)

    kernel = _make_mhsa_kernel(S, D, num_heads, hs, q_tile, kv_tile,
                               compute_dtype, approx_reciprocal)

    # VMEM budget derived from padded buffer sizes (not a hardcoded 32 MiB).
    cdb = jnp.dtype(compute_dtype).itemsize
    odb = jnp.dtype(x.dtype).itemsize
    io_blocks = [((1, S, D), cdb), ((1, 1, kv_tile), 4),
                 ((D, 3 * D), cdb), ((1, 3 * D), 4),
                 ((num_heads, hs, D), cdb), ((1, D), 4),
                 ((1, q_tile, D), odb)]
    scratch = ([((num_heads, S, hs), cdb)] * 3
               + [((num_heads, q_tile, 1), 4)] * 2
               + [((num_heads, q_tile, hs), 4)])
    temps = [((num_heads, q_tile, kv_tile), 4)] * 3 + [((q_tile, 3 * D), 4)]
    est = (2 * sum(_padded_bytes(s, i) for s, i in io_blocks)      # double buffers
           + sum(_padded_bytes(s, i) for s, i in scratch)
           + sum(_padded_bytes(s, i) for s, i in temps))
    vmem_limit = int(min(max(est * 1.25, 32 * 1024 * 1024), 100 * 1024 * 1024))

    # TODO(synk): on v7x with B == 1, shard the q axis across both TensorCores
    # (requires per-core K/V projection); consider pl.Buffered(1) on constant-index
    # weight inputs once single-buffer pipelining is confirmed safe.
    return pl.pallas_call(
        kernel,
        out_shape=jax.ShapeDtypeStruct((B, S, D), x.dtype),
        grid_spec=pltpu.PrefetchScalarGridSpec(
            num_scalar_prefetch=1,
            grid=(B, nq, nkv),
            in_specs=[
                pl.BlockSpec((1, S, D), lambda b, q, k, ta: (b, 0, 0)),          # x
                pl.BlockSpec((1, 1, kv_tile), lambda b, q, k, ta: (b, 0, k)),    # key mask
                pl.BlockSpec((D, 3 * D), lambda b, q, k, ta: (0, 0)),            # W_qkv
                pl.BlockSpec((1, 3 * D), lambda b, q, k, ta: (0, 0)),            # b_qkv
                pl.BlockSpec((num_heads, hs, D), lambda b, q, k, ta: (0, 0, 0)), # W_o
                pl.BlockSpec((1, D), lambda b, q, k, ta: (0, 0)),                # b_o
            ],
            out_specs=pl.BlockSpec((1, q_tile, D), lambda b, q, k, ta: (b, q, 0)),
            scratch_shapes=[
                pltpu.VMEM((num_heads, S, hs), compute_dtype),     # Q (pre-scaled)
                pltpu.VMEM((num_heads, S, hs), compute_dtype),     # K
                pltpu.VMEM((num_heads, S, hs), compute_dtype),     # V
                pltpu.VMEM((num_heads, q_tile, 1), jnp.float32),   # running max
                pltpu.VMEM((num_heads, q_tile, 1), jnp.float32),   # running denominator
                pltpu.VMEM((num_heads, q_tile, hs), jnp.float32),  # output accumulator
            ],
        ),
        compiler_params=pltpu.CompilerParams(
            dimension_semantics=("parallel", "arbitrary", "arbitrary"),
            vmem_limit_bytes=vmem_limit,
        ),
    )(tile_active, x_c, mask3, wqkv, bqkv, wo3, bo_f)


def _reference(x, key_mask, params, num_heads):
    """Pure-JAX f32 reference mirroring PyTorch MultiHeadSelfAttention.forward with
    mask = _make_attn_mask(key_mask)."""
    B, S, D = x.shape
    hs = D // num_heads

    def lin(t, wb):
        w_t, b = wb
        return t @ w_t + b[0]

    q = lin(x, params["q"])
    k = lin(x, params["k"])
    v = lin(x, params["v"])

    def to_heads(t):   # chunk along last dim, concat along batch dim -> (h*B, S, hs)
        return jnp.concatenate(
            [t[..., i * hs:(i + 1) * hs] for i in range(num_heads)], axis=0)

    Q, K, V = to_heads(q), to_heads(k), to_heads(v)
    score = (Q @ jnp.swapaxes(K, -1, -2)) / math.sqrt(hs)
    mask = jnp.broadcast_to(key_mask[:, None, :], (B, S, S))
    mask_h = jnp.concatenate([mask] * num_heads, axis=0)
    score = score + (1.0 - mask_h) * (-1e9)
    score = jax.nn.softmax(score, axis=-1)
    att = score @ V
    att = jnp.concatenate([att[i * B:(i + 1) * B] for i in range(num_heads)], axis=-1)
    return lin(att, params["o"])


if __name__ == "__main__":
    def make_case(B, S, d_model, h, valid_lens):
        key = jax.random.PRNGKey(0)
        keys = jax.random.split(key, 9)
        bound = 1.0 / math.sqrt(d_model)

        def init_linear(kw, kb):
            w = jax.random.uniform(kw, (d_model, d_model), jnp.float32, -bound, bound)
            b = jax.random.uniform(kb, (1, d_model), jnp.float32, -bound, bound)
            return (w.T, b)   # pre-transposed: kernel computes x @ W.T + b

        params = {
            "q": init_linear(keys[0], keys[1]),
            "k": init_linear(keys[2], keys[3]),
            "v": init_linear(keys[4], keys[5]),
            "o": init_linear(keys[6], keys[7]),
        }
        x = jax.random.normal(keys[8], (B, S, d_model), jnp.float32)
        # key-padding mask like CMCAD's enc_mask: (B, S), 1 = valid key
        key_mask = (jnp.arange(S)[None, :] <
                    jnp.asarray(valid_lens)[:, None]).astype(jnp.float32)
        return x, key_mask, params, h

    cases = [
        ("small  S=8   D=32", make_case(2, 8, 32, 4, [8, 5]), {}),
        # 2x2 (q, kv) tiles; second row's last KV tile is fully masked -> skipped.
        ("tiled  S=256 D=64", make_case(2, 256, 64, 4, [256, 100]),
         dict(q_tile=128, kv_tile=128)),
    ]

    for name, (x, key_mask, params, h), tiles in cases:
        ref = _reference(x, key_mask, params, h)

        # exact-ish path: f32 MXU operands, exact reciprocal
        out_f32 = jax.block_until_ready(
            multi_head_self_attention(x, key_mask, params, h,
                                      compute_dtype=jnp.float32,
                                      approx_reciprocal=False, **tiles))
        assert jnp.allclose(out_f32, ref, atol=2e-4, rtol=2e-4), f"f32 mismatch: {name}"

        # fast path: bf16 MXU operands + approx reciprocal (softmax/accum stay f32)
        out_bf16 = jax.block_until_ready(
            multi_head_self_attention(x, key_mask, params, h, **tiles))
        assert jnp.allclose(out_bf16, ref, atol=5e-2, rtol=5e-2), f"bf16 mismatch: {name}"

    print("KERNEL_OK")
</pallas_src>

<mosaic_0001>
module attributes {stable_mosaic.version = 11 : i64} {
  func.func @kernel(%arg0: i32, %arg1: i32, %arg2: i32, %arg3: memref<2x1xi32, #tpu.memory_space<smem>>, %arg4: memref<1x8x32xf32, #tpu.memory_space<vmem>>, %arg5: memref<1x1x8xf32, #tpu.memory_space<vmem>>, %arg6: memref<32x96xf32, #tpu.memory_space<vmem>>, %arg7: memref<1x96xf32, #tpu.memory_space<vmem>>, %arg8: memref<4x8x32xf32, #tpu.memory_space<vmem>>, %arg9: memref<1x32xf32, #tpu.memory_space<vmem>>, %arg10: memref<1x8x32xf32, #tpu.memory_space<vmem>>, %arg11: memref<4x8x8xf32, #tpu.memory_space<vmem>>, %arg12: memref<4x8x8xf32, #tpu.memory_space<vmem>>, %arg13: memref<4x8x8xf32, #tpu.memory_space<vmem>>, %arg14: memref<4x8x1xf32, #tpu.memory_space<vmem>>, %arg15: memref<4x8x1xf32, #tpu.memory_space<vmem>>, %arg16: memref<4x8x8xf32, #tpu.memory_space<vmem>>) attributes {dimension_semantics = [#tpu.dimension_semantics<parallel>, #tpu.dimension_semantics<arbitrary>, #tpu.dimension_semantics<arbitrary>], iteration_bounds = array<i64: 2, 1, 1>, scalar_prefetch = 1 : i64, scratch_operands = 6 : i64, tpu.core_type = #tpu.core_type<tc>, window_params = [{transform_indices = @transform_0, window_bounds = array<i64: 1, 8, 32>}, {transform_indices = @transform_1, window_bounds = array<i64: 1, 1, 8>}, {pipeline_mode = #tpu.pipeline_mode<synchronous>, transform_indices = @transform_2, window_bounds = array<i64: 32, 96>}, {pipeline_mode = #tpu.pipeline_mode<synchronous>, transform_indices = @transform_3, window_bounds = array<i64: 1, 96>}, {pipeline_mode = #tpu.pipeline_mode<synchronous>, transform_indices = @transform_4, window_bounds = array<i64: 4, 8, 32>}, {pipeline_mode = #tpu.pipeline_mode<synchronous>, transform_indices = @transform_5, window_bounds = array<i64: 1, 32>}, {transform_indices = @transform_6, window_bounds = array<i64: 1, 8, 32>}]} {
    %c0_i32 = arith.constant 0 : i32
    %0 = arith.cmpi eq, %arg1, %c0_i32 : i32
    %c0_i32_0 = arith.constant 0 : i32
    %1 = arith.cmpi eq, %arg2, %c0_i32_0 : i32
    %2 = arith.andi %0, %1 : i1
    %3 = arith.extui %2 : i1 to i32
    %c0_i32_1 = arith.constant 0 : i32
    %4 = arith.cmpi ne, %3, %c0_i32_1 : i32
    scf.if %4 {
      %c0 = arith.constant 0 : index
      %c0_9 = arith.constant 0 : index
      %21 = vector.load %arg6[%c0, %c0_9] : memref<32x96xf32, #tpu.memory_space<vmem>>, vector<32x96xf32>
      %c0_10 = arith.constant 0 : index
      %c0_11 = arith.constant 0 : index
      %22 = vector.load %arg7[%c0_10, %c0_11] : memref<1x96xf32, #tpu.memory_space<vmem>>, vector<1x96xf32>
      %c0_i32_12 = arith.constant 0 : i32
      %c8_i32_13 = arith.constant 8 : i32
      %23 = arith.muli %c0_i32_12, %c8_i32_13 : i32
      %24 = tpu.assume_multiple %23, 8 : i32
      %c0_14 = arith.constant 0 : index
      %25 = arith.index_cast %24 : i32 to index
      %c0_15 = arith.constant 0 : index
      %26 = vector.load %arg4[%c0_14, %25, %c0_15] : memref<1x8x32xf32, #tpu.memory_space<vmem>>, vector<1x8x32xf32>
      %27 = vector.shape_cast %26 : vector<1x8x32xf32> to vector<8x32xf32>
      %cst = arith.constant dense<0.000000e+00> : vector<8x96xf32>
      %28 = tpu.matmul %27, %21, %cst {dimension_numbers = #tpu.dot_dimension_numbers<[1], [0], [0], [1], [0, 0, 1, 1], [], []>} : vector<8x32xf32>, vector<32x96xf32>, vector<8x96xf32> -> vector<8x96xf32>
      %29 = vector.broadcast %22 : vector<1x96xf32> to vector<8x96xf32>
      %30 = arith.addf %28, %29 : vector<8x96xf32>
      %31 = vector.extract_strided_slice %30 {offsets = [0, 0], sizes = [8, 8], strides = [1, 1]} : vector<8x96xf32> to vector<8x8xf32>
      %cst_16 = arith.constant 0.353553385 : f32
      %32 = vector.broadcast %cst_16 : f32 to vector<8x8xf32>
      %33 = arith.mulf %31, %32 : vector<8x8xf32>
      %c0_17 = arith.constant 0 : index
      %34 = arith.index_cast %24 : i32 to index
      %c0_18 = arith.constant 0 : index
      %35 = vector.load %arg11[%c0_17, %34, %c0_18] : memref<4x8x8xf32, #tpu.memory_space<vmem>>, vector<1x8x8xf32>
      %36 = vector.shape_cast %35 : vector<1x8x8xf32> to vector<8x8xf32>
      %37 = vector.shape_cast %33 : vector<8x8xf32> to vector<1x8x8xf32>
      tpu.vector_store %arg11[%c0_17, %34, %c0_18], %37 {strides = array<i32>} : memref<4x8x8xf32, #tpu.memory_space<vmem>>, vector<1x8x8xf32>,
      %38 = vector.extract_strided_slice %30 {offsets = [0, 32], sizes = [8, 8], strides = [1, 1]} : vector<8x96xf32> to vector<8x8xf32>
      %c0_19 = arith.constant 0 : index
      %39 = arith.index_cast %24 : i32 to index
      %c0_20 = arith.constant 0 : index
      %40 = vector.load %arg12[%c0_19, %39, %c0_20] : memref<4x8x8xf32, #tpu.memory_space<vmem>>, vector<1x8x8xf32>
      %41 = vector.shape_cast %40 : vector<1x8x8xf32> to vector<8x8xf32>
      %42 = vector.shape_cast %38 : vector<8x8xf32> to vector<1x8x8xf32>
      tpu.vector_store %arg12[%c0_19, %39, %c0_20], %42 {strides = array<i32>} : memref<4x8x8xf32, #tpu.memory_space<vmem>>, vector<1x8x8xf32>,
      %43 = vector.extract_strided_slice %30 {offsets = [0, 64], sizes = [8, 8], strides = [1, 1]} : vector<8x96xf32> to vector<8x8xf32>
      %c0_21 = arith.constant 0 : index
      %44 = arith.index_cast %24 : i32 to index
      %c0_22 = arith.constant 0 : index
      %45 = vector.load %arg13[%c0_21, %44, %c0_22] : memref<4x8x8xf32, #tpu.memory_space<vmem>>, vector<1x8x8xf32>
      %46 = vector.shape_cast %45 : vector<1x8x8xf32> to vector<8x8xf32>
      %47 = vector.shape_cast %43 : vector<8x8xf32> to vector<1x8x8xf32>
      tpu.vector_store %arg13[%c0_21, %44, %c0_22], %47 {strides = array<i32>} : memref<4x8x8xf32, #tpu.memory_space<vmem>>, vector<1x8x8xf32>,
      %48 = vector.extract_strided_slice %30 {offsets = [0, 8], sizes = [8, 8], strides = [1, 1]} : vector<8x96xf32> to vector<8x8xf32>
      %cst_23 = arith.constant 0.353553385 : f32
      %49 = vector.broadcast %cst_23 : f32 to vector<8x8xf32>
      %50 = arith.mulf %48, %49 : vector<8x8xf32>
      %c1 = arith.constant 1 : index
      %51 = arith.index_cast %24 : i32 to index
      %c0_24 = arith.constant 0 : index
      %52 = vector.load %arg11[%c1, %51, %c0_24] : memref<4x8x8xf32, #tpu.memory_space<vmem>>, vector<1x8x8xf32>
      %53 = vector.shape_cast %52 : vector<1x8x8xf32> to vector<8x8xf32>
      %54 = vector.shape_cast %50 : vector<8x8xf32> to vector<1x8x8xf32>
      tpu.vector_store %arg11[%c1, %51, %c0_24], %54 {strides = array<i32>} : memref<4x8x8xf32, #tpu.memory_space<vmem>>, vector<1x8x8xf32>,
      %55 = vector.extract_strided_slice %30 {offsets = [0, 40], sizes = [8, 8], strides = [1, 1]} : vector<8x96xf32> to vector<8x8xf32>
      %c1_25 = arith.constant 1 : index
      %56 = arith.index_cast %24 : i32 to index
      %c0_26 = arith.constant 0 : index
      %57 = vector.load %arg12[%c1_25, %56, %c0_26] : memref<4x8x8xf32, #tpu.memory_space<vmem>>, vector<1x8x8xf32>
      %58 = vector.shape_cast %57 : vector<1x8x8xf32> to vector<8x8xf32>
      %59 = vector.shape_cast %55 : vector<8x8xf32> to vector<1x8x8xf32>
      tpu.vector_store %arg12[%c1_25, %56, %c0_26], %59 {strides = array<i32>} : memref<4x8x8xf32, #tpu.memory_space<vmem>>, vector<1x8x8xf32>,
      %60 = vector.extract_strided_slice %30 {offsets = [0, 72], sizes = [8, 8], strides = [1, 1]} : vector<8x96xf32> to vector<8x8xf32>
      %c1_27 = arith.constant 1 : index
      %61 = arith.index_cast %24 : i32 to index
      %c0_28 = arith.constant 0 : index
      %62 = vector.load %arg13[%c1_27, %61, %c0_28] : memref<4x8x8xf32, #tpu.memory_space<vmem>>, vector<1x8x8xf32>
      %63 = vector.shape_cast %62 : vector<1x8x8xf32> to vector<8x8xf32>
      %64 = vector.shape_cast %60 : vector<8x8xf32> to vector<1x8x8xf32>
      tpu.vector_store %arg13[%c1_27, %61, %c0_28], %64 {strides = array<i32>} : memref<4x8x8xf32, #tpu.memory_space<vmem>>, vector<1x8x8xf32>,
      %65 = vector.extract_strided_slice %30 {offsets = [0, 16], sizes = [8, 8], strides = [1, 1]} : vector<8x96xf32> to vector<8x8xf32>
      %cst_29 = arith.constant 0.353553385 : f32
      %66 = vector.broadcast %cst_29 : f32 to vector<8x8xf32>
      %67 = arith.mulf %65, %66 : vector<8x8xf32>
      %c2 = arith.constant 2 : index
      %68 = arith.index_cast %24 : i32 to index
      %c0_30 = arith.constant 0 : index
      %69 = vector.load %arg11[%c2, %68, %c0_30] : memref<4x8x8xf32, #tpu.memory_space<vmem>>, vector<1x8x8xf32>
      %70 = vector.shape_cast %69 : vector<1x8x8xf32> to vector<8x8xf32>
      %71 = vector.shape_cast %67 : vector<8x8xf32> to vector<1x8x8xf32>
      tpu.vector_store %arg11[%c2, %68, %c0_30], %71 {strides = array<i32>} : memref<4x8x8xf32, #tpu.memory_space<vmem>>, vector<1x8x8xf32>,
      %72 = vector.extract_strided_slice %30 {offsets = [0, 48], sizes = [8, 8], strides = [1, 1]} : vector<8x96xf32> to vector<8x8xf32>
      %c2_31 = arith.constant 2 : index
      %73 = arith.index_cast %24 : i32 to index
      %c0_32 = arith.constant 0 : index
      %74 = vector.load %arg12[%c2_31, %73, %c0_32] : memref<4x8x8xf32, #tpu.memory_space<vmem>>, vector<1x8x8xf32>
      %75 = vector.shape_cast %74 : vector<1x8x8xf32> to vector<8x8xf32>
      %76 = vector.shape_cast %72 : vector<8x8xf32> to vector<1x8x8xf32>
      tpu.vector_store %arg12[%c2_31, %73, %c0_32], %76 {strides = array<i32>} : memref<4x8x8xf32, #tpu.memory_space<vmem>>, vector<1x8x8xf32>,
      %77 = vector.extract_strided_slice %30 {offsets = [0, 80], sizes = [8, 8], strides = [1, 1]} : vector<8x96xf32> to vector<8x8xf32>
      %c2_33 = arith.constant 2 : index
      %78 = arith.index_cast %24 : i32 to index
      %c0_34 = arith.constant 0 : index
      %79 = vector.load %arg13[%c2_33, %78, %c0_34] : memref<4x8x8xf32, #tpu.memory_space<vmem>>, vector<1x8x8xf32>
      %80 = vector.shape_cast %79 : vector<1x8x8xf32> to vector<8x8xf32>
      %81 = vector.shape_cast %77 : vector<8x8xf32> to vector<1x8x8xf32>
      tpu.vector_store %arg13[%c2_33, %78, %c0_34], %81 {strides = array<i32>} : memref<4x8x8xf32, #tpu.memory_space<vmem>>, vector<1x8x8xf32>,
      %82 = vector.extract_strided_slice %30 {offsets = [0, 24], sizes = [8, 8], strides = [1, 1]} : vector<8x96xf32> to vector<8x8xf32>
      %cst_35 = arith.constant 0.353553385 : f32
      %83 = vector.broadcast %cst_35 : f32 to vector<8x8xf32>
      %84 = arith.mulf %82, %83 : vector<8x8xf32>
      %c3 = arith.constant 3 : index
      %85 = arith.index_cast %24 : i32 to index
      %c0_36 = arith.constant 0 : index
      %86 = vector.load %arg11[%c3, %85, %c0_36] : memref<4x8x8xf32, #tpu.memory_space<vmem>>, vector<1x8x8xf32>
      %87 = vector.shape_cast %86 : vector<1x8x8xf32> to vector<8x8xf32>
      %88 = vector.shape_cast %84 : vector<8x8xf32> to vector<1x8x8xf32>
      tpu.vector_store %arg11[%c3, %85, %c0_36], %88 {strides = array<i32>} : memref<4x8x8xf32, #tpu.memory_space<vmem>>, vector<1x8x8xf32>,
      %89 = vector.extract_strided_slice %30 {offsets = [0, 56], sizes = [8, 8], strides = [1, 1]} : vector<8x96xf32> to vector<8x8xf32>
      %c3_37 = arith.constant 3 : index
      %90 = arith.index_cast %24 : i32 to index
      %c0_38 = arith.constant 0 : index
      %91 = vector.load %arg12[%c3_37, %90, %c0_38] : memref<4x8x8xf32, #tpu.memory_space<vmem>>, vector<1x8x8xf32>
      %92 = vector.shape_cast %91 : vector<1x8x8xf32> to vector<8x8xf32>
      %93 = vector.shape_cast %89 : vector<8x8xf32> to vector<1x8x8xf32>
      tpu.vector_store %arg12[%c3_37, %90, %c0_38], %93 {strides = array<i32>} : memref<4x8x8xf32, #tpu.memory_space<vmem>>, vector<1x8x8xf32>,
      %94 = vector.extract_strided_slice %30 {offsets = [0, 88], sizes = [8, 8], strides = [1, 1]} : vector<8x96xf32> to vector<8x8xf32>
      %c3_39 = arith.constant 3 : index
      %95 = arith.index_cast %24 : i32 to index
      %c0_40 = arith.constant 0 : index
      %96 = vector.load %arg13[%c3_39, %95, %c0_40] : memref<4x8x8xf32, #tpu.memory_space<vmem>>, vector<1x8x8xf32>
      %97 = vector.shape_cast %96 : vector<1x8x8xf32> to vector<8x8xf32>
      %98 = vector.shape_cast %94 : vector<8x8xf32> to vector<1x8x8xf32>
      tpu.vector_store %arg13[%c3_39, %95, %c0_40], %98 {strides = array<i32>} : memref<4x8x8xf32, #tpu.memory_space<vmem>>, vector<1x8x8xf32>,
      %c1_i32 = arith.constant 1 : i32
    } else {
    }
    %c0_i32_2 = arith.constant 0 : i32
    %5 = arith.cmpi eq, %arg2, %c0_i32_2 : i32
    %6 = arith.extui %5 : i1 to i32
    %c0_i32_3 = arith.constant 0 : i32
    %7 = arith.cmpi ne, %6, %c0_i32_3 : i32
    scf.if %7 {
      %cst = arith.constant 0xFF800000 : f32
      %21 = vector.broadcast %cst : f32 to vector<4x8x1xf32>
      %c0 = arith.constant 0 : index
      %c0_9 = arith.constant 0 : index
      %c0_10 = arith.constant 0 : index
      %22 = vector.load %arg14[%c0, %c0_9, %c0_10] : memref<4x8x1xf32, #tpu.memory_space<vmem>>, vector<4x8x1xf32>
      tpu.vector_store %arg14[%c0, %c0_9, %c0_10], %21 {strides = array<i32>} : memref<4x8x1xf32, #tpu.memory_space<vmem>>, vector<4x8x1xf32>,
      %cst_11 = arith.constant 0.000000e+00 : f32
      %23 = vector.broadcast %cst_11 : f32 to vector<4x8x1xf32>
      %c0_12 = arith.constant 0 : index
      %c0_13 = arith.constant 0 : index
      %c0_14 = arith.constant 0 : index
      %24 = vector.load %arg15[%c0_12, %c0_13, %c0_14] : memref<4x8x1xf32, #tpu.memory_space<vmem>>, vector<4x8x1xf32>
      tpu.vector_store %arg15[%c0_12, %c0_13, %c0_14], %23 {strides = array<i32>} : memref<4x8x1xf32, #tpu.memory_space<vmem>>, vector<4x8x1xf32>,
      %cst_15 = arith.constant 0.000000e+00 : f32
      %25 = vector.broadcast %cst_15 : f32 to vector<4x8x8xf32>
      %c0_16 = arith.constant 0 : index
      %c0_17 = arith.constant 0 : index
      %c0_18 = arith.constant 0 : index
      %26 = vector.load %arg16[%c0_16, %c0_17, %c0_18] : memref<4x8x8xf32, #tpu.memory_space<vmem>>, vector<4x8x8xf32>
      tpu.vector_store %arg16[%c0_16, %c0_17, %c0_18], %25 {strides = array<i32>} : memref<4x8x8xf32, #tpu.memory_space<vmem>>, vector<4x8x8xf32>,
    } else {
    }
    %c8_i32 = arith.constant 8 : i32
    %8 = arith.muli %arg1, %c8_i32 : i32
    %9 = tpu.assume_multiple %8, 8 : i32
    %c8_i32_4 = arith.constant 8 : i32
    %10 = arith.muli %arg2, %c8_i32_4 : i32
    %11 = tpu.assume_multiple %10, 8 : i32
    %12 = arith.index_cast %arg0 : i32 to index
    %13 = arith.index_cast %arg2 : i32 to index
    %14 = memref.load %arg3[%12, %13] : memref<2x1xi32, #tpu.memory_space<smem>>
    %c0_i32_5 = arith.constant 0 : i32
    %15 = arith.cmpi ne, %14, %c0_i32_5 : i32
    %16 = arith.extui %15 : i1 to i32
    %c0_i32_6 = arith.constant 0 : i32
    %17 = arith.cmpi ne, %16, %c0_i32_6 : i32
    scf.if %17 {
      %c0 = arith.constant 0 : index
      %21 = arith.index_cast %9 : i32 to index
      %c0_9 = arith.constant 0 : index
      %22 = vector.load %arg11[%c0, %21, %c0_9] : memref<4x8x8xf32, #tpu.memory_space<vmem>>, vector<4x8x8xf32>
      %c0_10 = arith.constant 0 : index
      %23 = arith.index_cast %11 : i32 to index
      %c0_11 = arith.constant 0 : index
      %24 = vector.load %arg12[%c0_10, %23, %c0_11] : memref<4x8x8xf32, #tpu.memory_space<vmem>>, vector<4x8x8xf32>
      %c0_12 = arith.constant 0 : index
      %25 = arith.index_cast %11 : i32 to index
      %c0_13 = arith.constant 0 : index
      %26 = vector.load %arg13[%c0_12, %25, %c0_13] : memref<4x8x8xf32, #tpu.memory_space<vmem>>, vector<4x8x8xf32>
      "tpu.trace_start"() <{level = 10 : i32, message = "hqc,hkc->hqk"}> : () -> ()
      %cst = arith.constant dense<0.000000e+00> : vector<4x8x8xf32>
      %27 = tpu.matmul %22, %24, %cst {dimension_numbers = #tpu.dot_dimension_numbers<[2], [2], [1], [1], [0, 0, 0, 1, 1, 1], [0], [0]>} : vector<4x8x8xf32>, vector<4x8x8xf32>, vector<4x8x8xf32> -> vector<4x8x8xf32>
      "tpu.trace_stop"() : () -> ()
      %c0_14 = arith.constant 0 : index
      %c0_15 = arith.constant 0 : index
      %c0_16 = arith.constant 0 : index
      %28 = vector.load %arg5[%c0_14, %c0_15, %c0_16] : memref<1x1x8xf32, #tpu.memory_space<vmem>>, vector<1x1x8xf32>
      %29 = vector.shape_cast %28 : vector<1x1x8xf32> to vector<1x8xf32>
      %cst_17 = arith.constant 1.000000e+00 : f32
      %30 = vector.broadcast %cst_17 : f32 to vector<1x8xf32>
      %31 = arith.subf %30, %29 : vector<1x8xf32>
      %cst_18 = arith.constant -1.000000e+09 : f32
      %32 = vector.broadcast %cst_18 : f32 to vector<1x8xf32>
      %33 = arith.mulf %31, %32 : vector<1x8xf32>
      %34 = vector.shape_cast %33 : vector<1x8xf32> to vector<1x1x8xf32>
      %35 = vector.broadcast %34 : vector<1x1x8xf32> to vector<4x8x8xf32>
      %36 = arith.addf %27, %35 : vector<4x8x8xf32>
      %c0_19 = arith.constant 0 : index
      %c0_20 = arith.constant 0 : index
      %c0_21 = arith.constant 0 : index
      %37 = vector.load %arg14[%c0_19, %c0_20, %c0_21] : memref<4x8x1xf32, #tpu.memory_space<vmem>>, vector<4x8x1xf32>
      %cst_22 = arith.constant dense<0xFF800000> : vector<4x8xf32>
      %38 = vector.multi_reduction <maximumf>, %36, %cst_22 [2] : vector<4x8x8xf32> to vector<4x8xf32>
      %39 = vector.shape_cast %38 : vector<4x8xf32> to vector<4x8x1xf32>
      %40 = arith.maximumf %37, %39 : vector<4x8x1xf32>
      %41 = arith.subf %37, %40 : vector<4x8x1xf32>
      %42 = math.exp %41 : vector<4x8x1xf32>
      %43 = vector.broadcast %40 : vector<4x8x1xf32> to vector<4x8x8xf32>
      %44 = arith.subf %36, %43 : vector<4x8x8xf32>
      %45 = math.exp %44 : vector<4x8x8xf32>
      %c0_23 = arith.constant 0 : index
      %c0_24 = arith.constant 0 : index
      %c0_25 = arith.constant 0 : index
      %46 = vector.load %arg15[%c0_23, %c0_24, %c0_25] : memref<4x8x1xf32, #tpu.memory_space<vmem>>, vector<4x8x1xf32>
      %47 = arith.mulf %42, %46 : vector<4x8x1xf32>
      %cst_26 = arith.constant dense<0.000000e+00> : vector<4x8xf32>
      %48 = vector.multi_reduction <add>, %45, %cst_26 [2] : vector<4x8x8xf32> to vector<4x8xf32>
      %49 = vector.shape_cast %48 : vector<4x8xf32> to vector<4x8x1xf32>
      %50 = arith.addf %47, %49 : vector<4x8x1xf32>
      %c0_27 = arith.constant 0 : index
      %c0_28 = arith.constant 0 : index
      %c0_29 = arith.constant 0 : index
      %51 = vector.load %arg15[%c0_27, %c0_28, %c0_29] : memref<4x8x1xf32, #tpu.memory_space<vmem>>, vector<4x8x1xf32>
      tpu.vector_store %arg15[%c0_27, %c0_28, %c0_29], %50 {strides = array<i32>} : memref<4x8x1xf32, #tpu.memory_space<vmem>>, vector<4x8x1xf32>,
      %c0_30 = arith.constant 0 : index
      %c0_31 = arith.constant 0 : index
      %c0_32 = arith.constant 0 : index
      %52 = vector.load %arg16[%c0_30, %c0_31, %c0_32] : memref<4x8x8xf32, #tpu.memory_space<vmem>>, vector<4x8x8xf32>
      %53 = vector.broadcast %42 : vector<4x8x1xf32> to vector<4x8x8xf32>
      %54 = arith.mulf %53, %52 : vector<4x8x8xf32>
      "tpu.trace_start"() <{level = 10 : i32, message = "hqk,hkc->hqc"}> : () -> ()
      %cst_33 = arith.constant dense<0.000000e+00> : vector<4x8x8xf32>
      %55 = tpu.matmul %45, %26, %cst_33 {dimension_numbers = #tpu.dot_dimension_numbers<[2], [1], [1], [2], [0, 0, 0, 1, 1, 2], [0], [0]>} : vector<4x8x8xf32>, vector<4x8x8xf32>, vector<4x8x8xf32> -> vector<4x8x8xf32>
      "tpu.trace_stop"() : () -> ()
      %56 = arith.addf %54, %55 : vector<4x8x8xf32>
      %c0_34 = arith.constant 0 : index
      %c0_35 = arith.constant 0 : index
      %c0_36 = arith.constant 0 : index
      %57 = vector.load %arg16[%c0_34, %c0_35, %c0_36] : memref<4x8x8xf32, #tpu.memory_space<vmem>>, vector<4x8x8xf32>
      tpu.vector_store %arg16[%c0_34, %c0_35, %c0_36], %56 {strides = array<i32>} : memref<4x8x8xf32, #tpu.memory_space<vmem>>, vector<4x8x8xf32>,
      %c0_37 = arith.constant 0 : index
      %c0_38 = arith.constant 0 : index
      %c0_39 = arith.constant 0 : index
      %58 = vector.load %arg14[%c0_37, %c0_38, %c0_39] : memref<4x8x1xf32, #tpu.memory_space<vmem>>, vector<4x8x1xf32>
      tpu.vector_store %arg14[%c0_37, %c0_38, %c0_39], %40 {strides = array<i32>} : memref<4x8x1xf32, #tpu.memory_space<vmem>>, vector<4x8x1xf32>,
    } else {
    }
    %c0_i32_7 = arith.constant 0 : i32
    %18 = arith.cmpi eq, %arg2, %c0_i32_7 : i32
    %19 = arith.extui %18 : i1 to i32
    %c0_i32_8 = arith.constant 0 : i32
    %20 = arith.cmpi ne, %19, %c0_i32_8 : i32
    scf.if %20 {
      %c0 = arith.constant 0 : index
      %c0_9 = arith.constant 0 : index
      %c0_10 = arith.constant 0 : index
      %21 = vector.load %arg15[%c0, %c0_9, %c0_10] : memref<4x8x1xf32, #tpu.memory_space<vmem>>, vector<4x8x1xf32>
      %22 = tpu.reciprocal %21 : vector<4x8x1xf32> -> vector<4x8x1xf32>
      %c0_11 = arith.constant 0 : index
      %c0_12 = arith.constant 0 : index
      %c0_13 = arith.constant 0 : index
      %23 = vector.load %arg16[%c0_11, %c0_12, %c0_13] : memref<4x8x8xf32, #tpu.memory_space<vmem>>, vector<4x8x8xf32>
      %24 = vector.broadcast %22 : vector<4x8x1xf32> to vector<4x8x8xf32>
      %25 = arith.mulf %23, %24 : vector<4x8x8xf32>
      %c0_14 = arith.constant 0 : index
      %c0_15 = arith.constant 0 : index
      %c0_16 = arith.constant 0 : index
      %26 = vector.load %arg8[%c0_14, %c0_15, %c0_16] : memref<4x8x32xf32, #tpu.memory_space<vmem>>, vector<4x8x32xf32>
      "tpu.trace_start"() <{level = 10 : i32, message = "hqc,hcd->hqd"}> : () -> ()
      %cst = arith.constant dense<0.000000e+00> : vector<4x8x32xf32>
      %27 = tpu.matmul %25, %26, %cst {dimension_numbers = #tpu.dot_dimension_numbers<[2], [1], [1], [2], [0, 0, 0, 1, 1, 2], [0], [0]>} : vector<4x8x8xf32>, vector<4x8x32xf32>, vector<4x8x32xf32> -> vector<4x8x32xf32>
      "tpu.trace_stop"() : () -> ()
      %cst_17 = arith.constant dense<0.000000e+00> : vector<8x32xf32>
      %28 = vector.multi_reduction <add>, %27, %cst_17 [0] : vector<4x8x32xf32> to vector<8x32xf32>
      %c0_18 = arith.constant 0 : index
      %c0_19 = arith.constant 0 : index
      %29 = vector.load %arg9[%c0_18, %c0_19] : memref<1x32xf32, #tpu.memory_space<vmem>>, vector<1x32xf32>
      %30 = vector.broadcast %29 : vector<1x32xf32> to vector<8x32xf32>
      %31 = arith.addf %28, %30 : vector<8x32xf32>
      %c0_20 = arith.constant 0 : index
      %c0_21 = arith.constant 0 : index
      %c0_22 = arith.constant 0 : index
      %32 = vector.load %arg10[%c0_20, %c0_21, %c0_22] : memref<1x8x32xf32, #tpu.memory_space<vmem>>, vector<1x8x32xf32>
      %33 = vector.shape_cast %32 : vector<1x8x32xf32> to vector<8x32xf32>
      %34 = vector.shape_cast %31 : vector<8x32xf32> to vector<1x8x32xf32>
      tpu.vector_store %arg10[%c0_20, %c0_21, %c0_22], %34 {strides = array<i32>} : memref<1x8x32xf32, #tpu.memory_space<vmem>>, vector<1x8x32xf32>,
    } else {
    }
    return
  }
  func.func @transform_0(%arg0: i32, %arg1: i32, %arg2: i32, %arg3: memref<2x1xi32, #tpu.memory_space<smem>>) -> (i32, i32, i32) {
    %c0_i32 = arith.constant 0 : i32
    %c0_i32_0 = arith.constant 0 : i32
    %c0_i32_1 = arith.constant 0 : i32
    return %arg0, %c0_i32, %c0_i32_0 : i32, i32, i32
  }
  func.func @transform_1(%arg0: i32, %arg1: i32, %arg2: i32, %arg3: memref<2x1xi32, #tpu.memory_space<smem>>) -> (i32, i32, i32) {
    %c0_i32 = arith.constant 0 : i32
    %c0_i32_0 = arith.constant 0 : i32
    return %arg0, %c0_i32, %arg2 : i32, i32, i32
  }
  func.func @transform_2(%arg0: i32, %arg1: i32, %arg2: i32, %arg3: memref<2x1xi32, #tpu.memory_space<smem>>) -> (i32, i32) {
    %c0_i32 = arith.constant 0 : i32
    %c0_i32_0 = arith.constant 0 : i32
    %c0_i32_1 = arith.constant 0 : i32
    return %c0_i32, %c0_i32_0 : i32, i32
  }
  func.func @transform_3(%arg0: i32, %arg1: i32, %arg2: i32, %arg3: memref<2x1xi32, #tpu.memory_space<smem>>) -> (i32, i32) {
    %c0_i32 = arith.constant 0 : i32
    %c0_i32_0 = arith.constant 0 : i32
    %c0_i32_1 = arith.constant 0 : i32
    return %c0_i32, %c0_i32_0 : i32, i32
  }
  func.func @transform_4(%arg0: i32, %arg1: i32, %arg2: i32, %arg3: memref<2x1xi32, #tpu.memory_space<smem>>) -> (i32, i32, i32) {
    %c0_i32 = arith.constant 0 : i32
    %c0_i32_0 = arith.constant 0 : i32
    %c0_i32_1 = arith.constant 0 : i32
    %c0_i32_2 = arith.constant 0 : i32
    return %c0_i32, %c0_i32_0, %c0_i32_1 : i32, i32, i32
  }
  func.func @transform_5(%arg0: i32, %arg1: i32, %arg2: i32, %arg3: memref<2x1xi32, #tpu.memory_space<smem>>) -> (i32, i32) {
    %c0_i32 = arith.constant 0 : i32
    %c0_i32_0 = arith.constant 0 : i32
    %c0_i32_1 = arith.constant 0 : i32
    return %c0_i32, %c0_i32_0 : i32, i32
  }
  func.func @transform_6(%arg0: i32, %arg1: i32, %arg2: i32, %arg3: memref<2x1xi32, #tpu.memory_space<smem>>) -> (i32, i32, i32) {
    %c0_i32 = arith.constant 0 : i32
    %c0_i32_0 = arith.constant 0 : i32
    return %arg0, %arg1, %c0_i32 : i32, i32, i32
  }
}

</mosaic_0001>

<bundles_post_ra>
// kernel: tpu_custom_call.1
= control target key start
LH: loop header
LB: loop body
LE: loop exit
PB: predicated region body
PF: predicated region fallthrough
CT: control target
= control target key end

     0   :  { %s2726_s0 = inlined_call_operand.vmem [shape: s32[2,1], index: 0, kind: input, shape index: {}]   ;;  %s2727_s1 = inlined_call_operand.hbm [shape: f32[2,8,32], index: 1, kind: input, shape index: {}]   ;;  %s2728_s2 = inlined_call_operand.vmem [shape: f32[2,1,8], index: 2, kind: input, shape index: {}]   ;;  %s2729_s3 = inlined_call_operand.hbm [shape: f32[32,96], index: 3, kind: input, shape index: {}]   ;;  %s2730_s4 = inlined_call_operand.vmem [shape: f32[1,96], index: 4, kind: input, shape index: {}]   ;;  %s2731_s5 = inlined_call_operand.hbm [shape: f32[4,8,32], index: 5, kind: input, shape index: {}]   ;;  %s2732_s6 = inlined_call_operand.vmem [shape: f32[1,32], index: 6, kind: input, shape index: {}]   ;;  %s2733_s7 = inlined_call_operand.hbm [shape: f32[2,8,32], index: 7, kind: output, shape index: {}]  }
   0x1   :  { %s12_s26 = sshll.u32 %s2726_s0, 4  ;;  %s13_s26 = int_to_ptr.vmem [resolvable:$true] %s12_s26 }
   0x2   :  { %s2060_s27 = scalar_lea.vmem %s13_s26, 32  ;;  %p2065_p1 = scmp.lt.s32.totalorder %s13_s26, %s13_s26 }
   0x3   :  { %p2061_p0 = scmp.ne.s32.totalorder %s13_s26, %s2060_s27  ;;  %p2066_p2 = scmp.lt.s32.totalorder %s2060_s27, %s2060_s27 }
   0x5   :  { %p2067_p3 = por %p2066_p2, %p2065_p1 }
   0x7   :  { %p2068_p4 = pnand %p2067_p3, %p2061_p0 }
   0x9   :  { %2071 = shalt.err (!%p2068_p4)  }
   0xa   :  { %s2248_s28 = smov [#allocation9]  }
   0xb   :  { %15 = dma.vmem_to_smem %s13_s26, 32, %s2248_s28, [#allocation8] }
   0xc   :  { %2210 = dma.done.wait [#allocation8], 32 }
   0xd   :  { %2211 = vsyncadd [#allocation8], 4294967264 }
   0xe   :  { %17 = sfence }
   0xf   :  { %18 = vsyncpa [#allocation11], 0 }
  0x10   :  { %20 = vsyncpa [#allocation11 + $0x1], 0 }
  0x11   :  { %21 = vsyncpa [#allocation14], 0 }
  0x12   :  { %22 = vsyncpa [#allocation12], 0 }
  0x13   :  { %24 = vsyncpa [#allocation12 + $0x1], 0  ;;  %s2317_s29 = smov 0   ;;  %s2319_s0 = smov 0  }
  0x14   :  { %s2321_s30 = smov 0   ;;  %s2323_s8 = smov 0  }
  0x15   :  { %s2325_s9 = smov 0   ;;  %s2327_s10 = smov 0  }
  0x16 LB: > { %s1783_s11 = sadd.s32 4294967295, %s2246_s10   ;;  %s1784_s12 = sadd.s32 4294967294, %s2246_s10   ;;  %s2246_s10 = sphi %s2327_s10, %s30_s10   ;;  %s2242_s9 = sphi %s2325_s9, %s2758_s9   ;;  %s2238_s8 = sphi %s2323_s8, %s2757_s8   ;;  %s2234_s30 = sphi %s2321_s30, %s2756_s30   ;;  %s2230_s0 = sphi %s2319_s0, %s2755_s0   ;;  %s2226_s29 = sphi %s2317_s29, %s2754_s29  }
  0x17   : > { %p69_p5 = scmp.ne.s32.totalorder %s2230_s0, %s2226_s29  ;;  %p2351_p6 = scmp.eq.s32.totalorder %s1783_s11, 0 }
  0x18   : > { %p2355_p7 = scmp.eq.s32.totalorder %s1783_s11, 1  ;;  %p213_p8 = scmp.eq.s32.totalorder %s1784_s12, 1 }
  0x19   : > { %s2739_s13 = scalar_select %p2351_p6, 1, 0 }
  0x1a   : > { %p2361_p9 = por %p2351_p6, %p69_p5  ;;  %p1785_p10 = scmp.ge.s32.totalorder %s2246_s10, 1 }
  0x1b   : > { %p2366_p11 = por %p213_p8, %p69_p5  ;;  %p220_p12 = scmp.lt.s32.totalorder %s2246_s10, 3 }
  0x1c   : > { %s2741_s15 = scalar_select %p2361_p9, 1, 0 }
  0x1d   : > { %s2742_s16 = scalar_select %p2366_p11, 1, 0 }
  0x1e   : > { %p2371_p13 = pnand %p1785_p10, %p220_p12  ;;  %s2249_s18 = smov [#allocation13]  }
  0x1f   : > { %2743 = sst [smem:[#allocation21_spill]] %s2742_s16  ;;  %s232_s19 = sshll.u32 %s2249_s18, 4  ;;  %s2375_s19 = int_to_ptr.vmem [resolvable:$true] %s232_s19 }
  0x20   : > { %p1939_p0 = pneg %p2371_p13  ;;  %s2250_s21 = smov [#allocation15]  }
  0x21   : > { %s248_s22 = sshll.u32 %s2250_s21, 4  ;;  %s2072_s25 = scalar_lea.hbm %s2729_s3, 512  ;;  %s2386_s22 = int_to_ptr.vmem [resolvable:$true] %s248_s22 }
  0x22   : > { %p2382_p2 = pnand %p1939_p0, %p2351_p6  ;;  %p2073_p3 = scmp.ne.s32.totalorder %s2729_s3, %s2072_s25 }
  0x23   : > { %p2079_p10 = scmp.lt.u32.totalorder %s2072_s25, %s2729_s3 }
  0x24   : > { %p2074_p4 = pneg %p2382_p2 }
  0x26   : > { %p2075_p5 = pnand %p2074_p4, %p2073_p3 }
  0x28   : > { %p2076_p8 = pneg %p2075_p5 }
  0x2a   : > { %p2081_p12 = pnand %p2079_p10, %p2076_p8 }
  0x2c   : > { %2084 = shalt.err (!%p2081_p12)
}
  0x2d   : > { %s2085_s12 = scalar_lea.vmem %s2375_s19, 512  ;;  %p2093_p6 = scmp.lt.s32.totalorder %s2375_s19, %s2375_s19 }
  0x2e   : > { %p2086_p0 = scmp.ne.s32.totalorder %s2375_s19, %s2085_s12  ;;  %p2094_p3 = scmp.lt.s32.totalorder %s2085_s12, %s2085_s12 }
  0x30   : > { %p2088_p1 = pnand %p2086_p0, %p2074_p4  ;;  %p2095_p5 = por %p2094_p3, %p2093_p6 }
  0x32   : > { %p2089_p11 = pneg %p2088_p1 }
  0x34   : > { %p2096_p9 = pnand %p2095_p5, %p2089_p11 }
  0x36   : > { %2099 = shalt.err (!%p2096_p9)
}
  0x37   : > { %s2251_s18 = smov 128   ;;  %s2252_s21 = smov 8  }
  0x38   : > { %1942 = dma.hbm_to_vmem [thread:$0]  (!%p2382_p2), %s2729_s3, 512, %s2375_s19, [#allocation14], %s2251_s18, %s2251_s18, %s2252_s21  }
  0x39   : > { %s2100_s27 = scalar_lea.hbm %s2731_s5, 512 }
  0x3a   : > { %p2101_p6 = scmp.ne.s32.totalorder %s2731_s5, %s2100_s27  ;;  %p2107_p1 = scmp.lt.u32.totalorder %s2100_s27, %s2731_s5 }
  0x3c   : > { %p2103_p9 = pnand %p2101_p6, %p2074_p4 }
  0x3e   : > { %p2104_p11 = pneg %p2103_p9 }
  0x40   : > { %p2109_p8 = pnand %p2107_p1, %p2104_p11 }
  0x42   : > { %2112 = shalt.err (!%p2109_p8)
}
  0x43   : > { %s2113_s19 = scalar_lea.vmem %s2386_s22, 512  ;;  %p2121_p3 = scmp.lt.s32.totalorder %s2386_s22, %s2386_s22 }
  0x44   : > { %p2114_p10 = scmp.ne.s32.totalorder %s2386_s22, %s2113_s19  ;;  %p2122_p5 = scmp.lt.s32.totalorder %s2113_s19, %s2113_s19 }
  0x46   : > { %p2116_p12 = pnand %p2114_p10, %p2074_p4  ;;  %p2123_p6 = por %p2122_p5, %p2121_p3 }
  0x48   : > { %p2117_p0 = pneg %p2116_p12 }
  0x4a   : > { %p2124_p9 = pnand %p2123_p6, %p2117_p0 }
  0x4c   : > { %2127 = shalt.err (!%p2124_p9)
}
  0x4d   : > { %1945 = dma.hbm_to_vmem [thread:$0]  (!%p2382_p2), %s2731_s5, 512, %s2386_s22, [#allocation14], %s2251_s18, %s2251_s18, %s2252_s21  }
  0x4e   : > { %s49_s24 = sadd.s32 1, %s2242_s9  ;;  %s56_s25 = sadd.s32 1, %s2234_s30 }
  0x4f   : > { %p51_p4 = scmp.ge.s32.totalorder %s49_s24, 2  ;;  %p63_p11 = scmp.ne.s32.totalorder %s2234_s30, %s2230_s0 }
  0x50   : > { %p64_p1 = scmp.eq.s32.totalorder %s2246_s10, 0  ;;  %p1956_p8 = scmp.lt.s32.totalorder %s2246_s10, 2 }
  0x51   : > { %s2760_s24 = smov (%p51_p4, %s49_s24), 0  ;;  %p2450_p12 = por %p2355_p7, %p63_p11 }
  0x52   : > { %p65_p10 = por %p64_p1, %p63_p11  ;;  %s53_s26 = ssub.s32 %s2242_s9, %s2760_s24 }
  0x53   : > { %s2746_s20 = scalar_select %p2450_p12, 1, 0 }
  0x54   : > { %s265_s27 = sand.u32 1, %s2234_s30   ;;  %p54_p0 = scmp.eq.s32.totalorder %s53_s26, 0 }
  0x55   : > { %s1789_s22 = sshll.u32 %s265_s27, 3  ;;  %s1790_s18 = sshll.u32 %s2242_s9, 7 }
  0x56   : > { %s2459_s21 = scalar_select %p54_p0, %s2234_s30, %s56_s25  }
  0x57   : > { %s2464_s12 = scalar_lea.hbm %s2727_s1, %s1790_s18  ;;  %s269_s14 = scalar_lea.vmem [#allocation10], %s1789_s22 }
  0x58   : > { %s276_s19 = sshll.u32 %s269_s14, 4  ;;  %p2468_p7 = pnand %p1956_p8, %p65_p10  ;;  %s2472_s19 = int_to_ptr.vmem [resolvable:$true] %s276_s19 }
  0x59   : > { %s266_s23 = scalar_lea.sflag [#allocation11], %s265_s27  ;;  %s2128_s25 = scalar_lea.hbm %s2464_s12, 128 }
  0x5a   : > { %p2129_p2 = scmp.ne.s32.totalorder %s2464_s12, %s2128_s25  ;;  %p2130_p3 = pneg %p2468_p7 }
  0x5b   : > { %s2133_s18 = scalar_lea.hbm %s2727_s1, 256  ;;  %p2134_p9 = scmp.lt.u32.totalorder %s2464_s12, %s2727_s1 }
  0x5c   : > { %p2131_p5 = pnand %p2130_p3, %p2129_p2  ;;  %p2135_p4 = scmp.lt.u32.totalorder %s2133_s18, %s2128_s25 }
  0x5d   : > { %p2137_p1 = scmp.lt.u32.totalorder %s2128_s25, %s2464_s12 }
  0x5e   : > { %p2132_p6 = pneg %p2131_p5  ;;  %p2136_p11 = por %p2135_p4, %p2134_p9 }
  0x60   : > { %p2138_p8 = por %p2137_p1, %p2136_p11 }
  0x62   : > { %p2139_p10 = pnand %p2138_p8, %p2132_p6 }
  0x64   : > { %2142 = shalt.err (!%p2139_p10)
}
  0x65   : > { %s2143_s27 = scalar_lea.vmem %s2472_s19, 128  ;;  %s2253_s14 = smov [#allocation10]  }
  0x66   : > { %p2144_p0 = scmp.ne.s32.totalorder %s2472_s19, %s2143_s27  ;;  %s2148_s26 = sshll.u32 %s2253_s14, 4  ;;  %s2149_s26 = int_to_ptr.vmem [resolvable:$false] %s2148_s26 }
  0x67   : > { %s2150_s22 = scalar_lea.vmem %s2149_s26, 256  ;;  %p2151_p12 = scmp.lt.s32.totalorder %s2472_s19, %s2149_s26 }
  0x68   : > { %p2146_p2 = pnand %p2144_p0, %p2130_p3  ;;  %p2152_p9 = scmp.lt.s32.totalorder %s2150_s22, %s2143_s27 }
  0x6a   : > { %p2147_p5 = pneg %p2146_p2  ;;  %p2153_p4 = por %p2152_p9, %p2151_p12 }
  0x6c   : > { %p2154_p11 = pnand %p2153_p4, %p2147_p5 }
  0x6e   : > { %2157 = shalt.err (!%p2154_p11)
}
  0x6f   : > { %1949 = dma.hbm_to_vmem [thread:$0]  (!%p2468_p7), %s2464_s12, 128, %s2472_s19, %s266_s23  }
  0x70   : > { %294 = sbr.rel (%p2371_p13) target bundleno = 1590 (0x636), region = 44  ;;  %s2502_s25 = sand.u32 (!%p2371_p13), 1, %s2230_s0  }
  0x71   : > { %s1792_s18 = sshll.u32 (!%p2371_p13), %s2502_s25, 3  ;;  %s297_s28 = scalar_lea.sflag (!%p2371_p13), [#allocation11], %s2502_s25 }
  0x72   : > { %s2508_s11 = scalar_lea.vmem (!%p2371_p13), [#allocation10], %s1792_s18  ;;  %p2748_p12 = scmp.ne.s32.totalorder (!%p2371_p13), %s2741_s15, 0 }
  0x77   : > { %2213 = dma.done.wait (%p2748_p12), %s297_s28, 128  }
  0x78   : > { %2215 = vsyncadd (%p2748_p12), %s297_s28, 4294967168  ;;  %p2749_p7 = scmp.ne.s32.totalorder %s2739_s13, 0 }
  0x7a   : > { %2217 = dma.done.wait (%p2749_p7), [#allocation14], 1024  }
  0x7b   : > { %2219 = vsyncadd (%p2749_p7), [#allocation14], 4294966272  ;;  %s1798_s17 = sshll.u32 %s2238_s8, 7  ;;  %p343_p13 = scmp.lt.s32.totalorder %s2238_s8, 1  ;;  %v2254_v0 = vmov 0.0|0.0   ;;  %vm442_vm0 = vcmask 64512  }
  0x7c   : > { %s2521_s12 = sld [smem:[#allocation9 + %s1798_s17]]  ;;  %1921 = vmatprep.subr.bf16.mxu0 %v2254_v0  ;;  %vm505_vm1 = vcmask 7168   ;;  %vm2255_vm2 = vmmov 0   ;;  %v2256_v1 = vmov 0.0   ;;  %v2257_v2 = vmov -inf   ;;  %v355_v3 = vld [vmem:[#allocation13] sm:$0xff] }
  0x7d   : > { %1858 = vmatprep.mubr.msk.f32.mxu0 %vm2255_vm2, %v2256_v1  ;;  %506 = vst.msk [vmem:[#allocation5] sm:$0xff] %vm505_vm1, %v2257_v2  ;;  %507 = vst.msk [vmem:[#allocation5 + $0x8] sm:$0xff] %vm505_vm1, %v2257_v2  ;;  %s2549_s13 = scalar_select %p343_p13, %s2238_s8, 1  ;;  %v356_v4 = vld [vmem:[#allocation13 + $0x8] sm:$0xff]  ;;  %v357_v5 = vld [vmem:[#allocation13 + $0x10] sm:$0xff]  ;;  %vm367_vm3 = vcmask 261120  }
  0x7e   : > { %508 = vst.msk [vmem:[#allocation5 + $0x10] sm:$0xff] %vm505_vm1, %v2257_v2  ;;  %509 = vst.msk [vmem:[#allocation5 + $0x18] sm:$0xff] %vm505_vm1, %v2257_v2  ;;  %v1922_v6 = vpack.c.bf16 %v356_v4, %v355_v3  ;;  %v358_v7 = vld [vmem:[#allocation13 + $0x18] sm:$0xff]  ;;  %v1796_v10 = vld [vmem:[%s2730_s4] ss:$0 sm:$0xff]  ;;  %s2258_s14 = smov 88  }
  0x7f   : > { %510 = vst.msk [vmem:[#allocation6] sm:$0xff] %vm505_vm1, %v2256_v1  ;;  %511 = vst.msk [vmem:[#allocation6 + $0x8] sm:$0xff] %vm505_vm1, %v2256_v1  ;;  %s348_s16 = scalar_lea.vmem %s2728_s2, %s2549_s13  ;;  %v1925_v8 = vpack.c.bf16 %v358_v7, %v357_v5  ;;  %v360_v9 = vld [vmem:[%s2508_s11] sm:$0xff]  ;;  %s2259_s26 = smov 96  }
  0x80   : > { %512 = vst.msk [vmem:[#allocation6 + $0x10] sm:$0xff] %vm505_vm1, %v2256_v1  ;;  %513 = vst.msk [vmem:[#allocation6 + $0x18] sm:$0xff] %vm505_vm1, %v2256_v1  ;;  %1923 = vmatpush3.bf16.msra.mxu0 %v1922_v6  ;;  %s2260_s22 = smov 48   ;;  %s2261_s28 = smov 64  }
  0x81   : > { %515 = vst.msk [vmem:[#allocation7] sm:$0xff] %vm442_vm0, %v2256_v1  ;;  %516 = vst.msk [vmem:[#allocation7 + $0x8] sm:$0xff] %vm442_vm0, %v2256_v1  ;;  %1924 = vmatprep.subr.bf16.mxu0 %v2254_v0  ;;  %s2262_s11 = smov 56   ;;  %s2263_s15 = smov 120  }
  0x82   : > { %517 = vst.msk [vmem:[#allocation7 + $0x10] sm:$0xff] %vm442_vm0, %v2256_v1  ;;  %518 = vst.msk [vmem:[#allocation7 + $0x18] sm:$0xff] %vm442_vm0, %v2256_v1  ;;  %s2264_s19 = smov 80   ;;  %s2265_s23 = smov 112  }
  0x83   : > { %s2266_s27 = smov 104   ;;  %p1799_p3 = scmp.eq.s32.totalorder %s2521_s12, 0 }
  0x84   : > { %1926 = vmatpush3.bf16.msra.mxu0 %v1925_v8  ;;  %v2269_v28 = vmov (!%p1799_p3), 0.0   ;;  %vm2270_vm4 = vmmov (!%p1799_p3), 0   ;;  %v552_v35 = vlaneseq (!%p1799_p3)  ;;  %v548_v36 = vld [vmem:[%s348_s16] sm:$0x1] (!%p1799_p3)  ;;  %v2271_v58 = vmov (!%p1799_p3), 0   ;;  %v862_v59 = vld [vmem:[#allocation5] sm:$0xff] (!%p1799_p3) }
  0x85   : > { %1861 = vmatprep.subr.mxu0 (!%p1799_p3), %v2269_v28  ;;  %1866 = vmatprep.subr.mxu1 (!%p1799_p3), %v2269_v28  ;;  %v549_v37 = vsub.f32 (!%p1799_p3), 1.0, %v548_v36  ;;  %v2612_v62 = vld [vmem:[#allocation5 + $0x8] sm:$0xff] (!%p1799_p3)  ;;  %v864_v63 = vld [vmem:[#allocation5 + $0x10] sm:$0xff] (!%p1799_p3)  ;;  %v2616_v7 = vld [vmem:[#allocation5 + $0x18] sm:$0xff] (!%p1799_p3) }
  0x86   : > { %1868 = vmatprep.mubr.msk.f32.mxu1 (!%p1799_p3), %vm2270_vm4, %v2269_v28  ;;  %v553_v38 = vshrl.u32 (!%p1799_p3), %v552_v35, 7  ;;  %2032 = vset.pattern.permute.xlu0 (!%p1799_p3), %v2271_v58 }
  0x87   : > { %1859 = vmatmul.mubr.msk.f32.vlgmr.msra.gmra.mrb[0].mxu0 %vm367_vm3, %v360_v9  ;;  %v550_v39 = vmul.f32 (!%p1799_p3), -1e+09, %v549_v37  ;;  %2033 = vset.pattern.permute.xlu1 (!%p1799_p3), %v2271_v58 }
  0x88   : > { %1863 = vmatprep.mubr.msk.f32.mxu0 (!%p1799_p3), %vm2270_vm4, %v2269_v28  ;;  %v554_v40 = vsub.s32 (!%p1799_p3), 0, %v553_v38 }
  0x8a   : > { %v555_v41 = vrot.slane (!%p1799_p3), %v550_v39, %v554_v40 }
 0x15a   : > { %v437_v11 = vpop.f32.mrb[0].mxu0 }
 0x15b   : > { %v438_v12 = vadd.f32 %v1796_v10, %v437_v11  ;;  %v1860_v13 = vpop.f32.mrb[1].mxu0 }
 0x15d   : > { %460 = vrot.lane.b32.xlu1 %v438_v12, %s2258_s14  ;;  %445 = vrot.lane.b32.xlu0 %v438_v12, %s2259_s26  ;;  %v441_v14 = vmul.f32 0.35355338, %v438_v12  ;;  %s2267_s14 = smov 72   ;;  %s2268_s26 = smov 40  }
 0x15f   : > { %443 = vst.msk [vmem:[#allocation2] sm:$0xff] %vm442_vm0, %v441_v14 }
 0x161   : > { %481 = vrot.lane.b32.xlu1 %v438_v12, %s2260_s22  ;;  %449 = vrot.lane.b32.xlu0 %v438_v12, %s2261_s28  ;;  %s2574_s22 = scalar_lea.vmem [#allocation16], %s1792_s18 }
 0x165   : > { %465 = vrot.lane.b32.xlu0 %v438_v12, %s2262_s11  ;;  %454 = vrot.lane.b32.xlu1 %v441_v14, %s2263_s15 }
 0x166   : > { %v534_v29 = vld [vmem:[#allocation2] sm:$0xff] (!%p1799_p3) }
 0x169   : > { %476 = vrot.lane.b32.xlu0 %v438_v12, %s2264_s19  ;;  %470 = vrot.lane.b32.xlu1 %v441_v14, %s2265_s23 }
 0x16d   : > { %486 = vrot.lane.b32.xlu0 %v441_v14, %s2266_s27  ;;  %492 = vrot.lane.b32.xlu1 %v438_v12, %s2267_s14 }
 0x171   : > { %497 = vrot.lane.b32.xlu0 %v438_v12, %s2268_s26 }
 0x1cf   : > { %v461_v15 = vpop.permute.xlu1 %460  ;;  %v446_v16 = vpop.permute.xlu0 %445 }
 0x1d0   : > { %464 = vst.msk [vmem:[#allocation3 + $0x8] sm:$0xff] %vm442_vm0, %v461_v15  ;;  %448 = vst.msk [vmem:[#allocation3] sm:$0xff] %vm442_vm0, %v446_v16 }
 0x1d3   : > { %v482_v17 = vpop.permute.xlu1 %481  ;;  %v450_v18 = vpop.permute.xlu0 %449 }
 0x1d4   : > { %485 = vst.msk [vmem:[#allocation4 + $0x10] sm:$0xff] %vm442_vm0, %v482_v17  ;;  %452 = vst.msk [vmem:[#allocation4] sm:$0xff] %vm442_vm0, %v450_v18 }
 0x1d7   : > { %v466_v19 = vpop.permute.xlu0 %465  ;;  %v455_v20 = vpop.permute.xlu1 %454  ;;  %v539_v26 = vld [vmem:[#allocation3] sm:$0xff] (!%p1799_p3)  ;;  %v540_v27 = vld [vmem:[#allocation3 + $0x8] sm:$0xff] (!%p1799_p3) }
 0x1d8   : > { %469 = vst.msk [vmem:[#allocation4 + $0x8] sm:$0xff] %vm442_vm0, %v466_v19  ;;  %459 = vst.msk [vmem:[#allocation2 + $0x8] sm:$0xff] %vm442_vm0, %v455_v20  ;;  %1862 = vmatpush3.xpose.msk.msra.mxu0 (!%p1799_p3), %vm442_vm0, %v539_v26  ;;  %1867 = vmatpush3.xpose.msk.msra.mxu1 (!%p1799_p3), %vm442_vm0, %v540_v27 }
 0x1d9   : > { %1871 = vmatprep.subr.mxu0 (!%p1799_p3), %v2269_v28  ;;  %1876 = vmatprep.subr.mxu1 (!%p1799_p3), %v2269_v28 }
 0x1db   : > { %v477_v21 = vpop.permute.xlu0 %476  ;;  %v471_v22 = vpop.permute.xlu1 %470  ;;  %1864 = vmatmul.mubr.msk.f32.vlgmr.msra.gmra.mrb[0].mxu0 (!%p1799_p3), %vm442_vm0, %v534_v29  ;;  %v544_v13 = vld [vmem:[#allocation4] sm:$0xff] (!%p1799_p3)  ;;  %v546_v27 = vld [vmem:[#allocation4 + $0x10] sm:$0xff] (!%p1799_p3) }
 0x1dc   : > { %480 = vst.msk [vmem:[#allocation3 + $0x10] sm:$0xff] %vm442_vm0, %v477_v21  ;;  %475 = vst.msk [vmem:[#allocation2 + $0x10] sm:$0xff] %vm442_vm0, %v471_v22  ;;  %1873 = vmatprep.mubr.msk.f32.mxu0 (!%p1799_p3), %vm2270_vm4, %v2269_v28 }
 0x1de   : > { %532 = sbr.rel (%p1799_p3) target bundleno = 1208 (0x4b8), region = 68 }
 0x1df   : > { %v487_v23 = vpop.permute.xlu0 %486  ;;  %v493_v24 = vpop.permute.xlu1 %492  ;;  %v535_v30 = vld [vmem:[#allocation2 + $0x8] sm:$0xff] (!%p1799_p3) }
 0x1e0   : > { %491 = vst.msk [vmem:[#allocation2 + $0x18] sm:$0xff] %vm442_vm0, %v487_v23  ;;  %496 = vst.msk [vmem:[#allocation3 + $0x18] sm:$0xff] %vm442_vm0, %v493_v24  ;;  %1869 = vmatmul.mubr.msk.f32.vlgmr.msra.gmra.mrb[0].mxu1 (!%p1799_p3), %vm442_vm0, %v535_v30  ;;  %v545_v15 = vld [vmem:[#allocation4 + $0x8] sm:$0xff] (!%p1799_p3) }
 0x1e1   : > { %1878 = vmatprep.mubr.msk.f32.mxu1 (!%p1799_p3), %vm2270_vm4, %v2269_v28 }
 0x1e3   : > { %v498_v25 = vpop.permute.xlu0 %497  ;;  %v541_v31 = vld [vmem:[#allocation3 + $0x10] sm:$0xff] (!%p1799_p3) }
 0x1e4   : > { %501 = vst.msk [vmem:[#allocation4 + $0x18] sm:$0xff] %vm442_vm0, %v498_v25  ;;  %1872 = vmatpush3.xpose.msk.msra.mxu0 (!%p1799_p3), %vm442_vm0, %v541_v31  ;;  %v536_v33 = vld [vmem:[#allocation2 + $0x10] sm:$0xff] (!%p1799_p3) }
 0x1e5   : > { %1881 = vmatprep.subr.mxu0 %v2269_v28 }
 0x1e7   : > { %v542_v32 = vld [vmem:[#allocation3 + $0x18] sm:$0xff]  ;;  %1874 = vmatmul.mubr.msk.f32.vlgmr.msra.gmra.mrb[2].mxu0 %vm442_vm0, %v536_v33 }
 0x1e8   : > { %1877 = vmatpush3.xpose.msk.msra.mxu1 %vm442_vm0, %v542_v32  ;;  %v537_v34 = vld [vmem:[#allocation2 + $0x18] sm:$0xff]  ;;  %1883 = vmatprep.mubr.msk.f32.mxu0 %vm2270_vm4, %v2269_v28 }
 0x1e9   : > { %1886 = vmatprep.subr.mxu1 %v2269_v28  ;;  %1882 = vmatpush3.msra.mxu0 %v544_v13 }
 0x1ea   : > { %1891 = vmatprep.subr.mxu0 %v2269_v28 }
 0x1eb   : > { %1879 = vmatmul.mubr.msk.f32.vlgmr.msra.gmra.mrb[2].mxu1 %vm442_vm0, %v537_v34  ;;  %v547_v32 = vld [vmem:[#allocation4 + $0x18] sm:$0xff] }
 0x1ec   : > { %1888 = vmatprep.mubr.msk.f32.mxu1 %vm2270_vm4, %v2269_v28  ;;  %1887 = vmatpush3.msra.mxu1 %v545_v15 }
 0x1ed   : > { %1896 = vmatprep.subr.mxu1 %v2269_v28 }
 0x2ae   : > { %v630_v42 = vpop.f32.mrb[0].mxu0 }
 0x2af   : > { %v631_v43 = vadd.f32 %v630_v42, %v555_v41  ;;  %v1865_v44 = vpop.f32.mrb[1].mxu0 }
 0x2b1   : > { %v866_v48 = vsel %vm442_vm0, %v631_v43, -inf }
 0x2b2   : > { %867 = vmax.xlane.f32.xlu0 %v866_v48  ;;  %v927_v48 = vld [vmem:[#allocation6 + $0x8] sm:$0xff] }
 0x2b3   : > { %v706_v45 = vpop.f32.mrb[0].mxu1 }
 0x2b4   : > { %v707_v46 = vadd.f32 %v706_v45, %v555_v41  ;;  %v1870_v47 = vpop.f32.mrb[1].mxu1  ;;  %v926_v45 = vld [vmem:[#allocation6] sm:$0xff] }
 0x2b6   : > { %v869_v51 = vsel %vm442_vm0, %v707_v46, -inf }
 0x2b7   : > { %870 = vmax.xlane.f32.xlu0 %v869_v51 }
 0x2ba   : > { %v782_v49 = vpop.f32.mrb[2].mxu0 }
 0x2bb   : > { %v783_v50 = vadd.f32 %v782_v49, %v555_v41  ;;  %v1875_v52 = vpop.f32.mrb[3].mxu0 }
 0x2bd   : > { %v872_v56 = vsel %vm442_vm0, %v783_v50, -inf }
 0x2be   : > { %v858_v53 = vpop.f32.mrb[2].mxu1  ;;  %873 = vmax.xlane.f32.xlu1 %v872_v56 }
 0x2bf   : > { %v859_v54 = vadd.f32 %v858_v53, %v555_v41  ;;  %v1880_v55 = vpop.f32.mrb[3].mxu1 }
 0x2c1   : > { %v875_v57 = vsel %vm442_vm0, %v859_v54, -inf }
 0x2c2   : > { %876 = vmax.xlane.f32.xlu1 %v875_v57  ;;  %v929_v57 = vld [vmem:[#allocation6 + $0x18] sm:$0xff] }
 0x33f   : > { %v868_v60 = vpop.xlane.xlu0 %867 }
 0x340   : > { %v878_v61 = vmax.f32 %v862_v59, %v868_v60 }
 0x342   : > { %v882_v0 = vsub.f32 %v862_v59, %v878_v61  ;;  %1283 = vst.msk [vmem:[#allocation5] sm:$0xff] %vm505_vm1, %v878_v61  ;;  %896 = vperm.xlu0 %2032, %v878_v61  }
 0x344   : > { %v871_v2 = vpop.xlane.xlu0 %870  ;;  %v886_v4 = vmul.f32 1.442695, %v882_v0  ;;  %v956_v0 = vld [vmem:[#allocation7 + $0x8] sm:$0xff] }
 0x345   : > { %v879_v5 = vmax.f32 %v2612_v62, %v871_v2 }
 0x346   : > { %2034 = vpow2.f32 %v886_v4 }
 0x347   : > { %v883_v8 = vsub.f32 %v2612_v62, %v879_v5  ;;  %1284 = vst.msk [vmem:[#allocation5 + $0x8] sm:$0xff] %vm505_vm1, %v879_v5  ;;  %901 = vperm.xlu1 %2033, %v879_v5   ;;  %v955_v62 = vld [vmem:[#allocation7] sm:$0xff] }
 0x349   : > { %v888_v38 = vmul.f32 1.442695, %v883_v8 }
 0x34b   : > { %v874_v3 = vpop.xlane.xlu1 %873 }
 0x34c   : > { %v880_v6 = vmax.f32 %v864_v63, %v874_v3 }
 0x34e   : > { %v884_v9 = vsub.f32 %v864_v63, %v880_v6  ;;  %1285 = vst.msk [vmem:[#allocation5 + $0x10] sm:$0xff] %vm505_vm1, %v880_v6  ;;  %906 = vperm.xlu1 %2033, %v880_v6  }
 0x34f   : > { %v877_v10 = vpop.xlane.xlu1 %876 }
 0x350   : > { %v881_v11 = vmax.f32 %v2616_v7, %v877_v10  ;;  %v2035_v14 = vpop.eup %2034  ;;  %v890_v34 = vmul.f32 1.442695, %v884_v9 }
 0x352   : > { %v885_v12 = vsub.f32 %v2616_v7, %v881_v11  ;;  %1286 = vst.msk [vmem:[#allocation5 + $0x18] sm:$0xff] %vm505_vm1, %v881_v11  ;;  %911 = vperm.xlu1 %2033, %v881_v11   ;;  %v957_v7 = vld [vmem:[#allocation7 + $0x10] sm:$0xff] }
 0x356   : > { %961 = vperm.xlu1 %2033, %v2035_v14  }
 0x3c1   : > { %v897_v16 = vpop.permute.xlu0 %896 }
 0x3c2   : > { %v914_v17 = vsub.f32 %v631_v43, %v897_v16 }
 0x3c4   : > { %v918_v18 = vmul.f32 1.442695, %v914_v17 }
 0x3c6   : > { %v902_v19 = vpop.permute.xlu1 %901  ;;  %2036 = vpow2.f32 %v918_v18 }
 0x3c7   : > { %v915_v20 = vsub.f32 %v707_v46, %v902_v19  ;;  %v930_v46 = vmul.f32 %v2035_v14, %v926_v45 }
 0x3c9   : > { %v920_v21 = vmul.f32 1.442695, %v915_v20 }
 0x3cb   : > { %2038 = vpow2.f32 %v920_v21 }
 0x3cd   : > { %v907_v22 = vpop.permute.xlu1 %906 }
 0x3ce   : > { %v916_v23 = vsub.f32 %v783_v50, %v907_v22 }
 0x3d0   : > { %v922_v24 = vmul.f32 1.442695, %v916_v23  ;;  %v2037_v29 = vpop.eup %2036 }
 0x3d1   : > { %v912_v25 = vpop.permute.xlu1 %911  ;;  %1884 = vmatmul.mubr.msk.f32.vlgmr.msra.gmra.mrb[4].mxu0 %vm442_vm0, %v2037_v29  ;;  %v934_v31 = vsel %vm442_vm0, %v2037_v29, 0.0 }
 0x3d2   : > { %2040 = vpow2.f32 %v922_v24  ;;  %v917_v26 = vsub.f32 %v859_v54, %v912_v25  ;;  %935 = vadd.xlane.f32.xlu1 %v934_v31  ;;  %1892 = vmatpush3.msra.mxu0 %v546_v27  ;;  %v928_v54 = vld [vmem:[#allocation6 + $0x10] sm:$0xff] }
 0x3d3   : > { %1893 = vmatprep.mubr.msk.f32.mxu0 %vm2270_vm4, %v2269_v28 }
 0x3d4   : > { %v924_v30 = vmul.f32 1.442695, %v917_v26 }
 0x3d5   : > { %v2039_v33 = vpop.eup %2038  ;;  %v962_v44 = vpop.permute.xlu1 %961 }
 0x3d6   : > { %2042 = vpow2.f32 %v924_v30  ;;  %1889 = vmatmul.mubr.msk.f32.vlgmr.msra.gmra.mrb[4].mxu1 %vm442_vm0, %v2039_v33  ;;  %v937_v35 = vsel %vm442_vm0, %v2039_v33, 0.0  ;;  %v979_v63 = vmul.f32 %v962_v44, %v955_v62 }
 0x3d7   : > { %938 = vadd.xlane.f32.xlu0 %v937_v35  ;;  %1897 = vmatpush3.msra.mxu1 %v547_v32  ;;  %2044 = vpow2.f32 %v890_v34 }
 0x3d8   : > { %1898 = vmatprep.mubr.msk.f32.mxu1 %vm2270_vm4, %v2269_v28  ;;  %2046 = vpow2.f32 %v888_v38  ;;  %v892_v28 = vmul.f32 1.442695, %v885_v12  ;;  %v958_v12 = vld [vmem:[#allocation7 + $0x18] sm:$0xff] }
 0x3da   : > { %2048 = vpow2.f32 %v892_v28 }
 0x3dc   : > { %v2041_v36 = vpop.eup %2040 }
 0x3dd   : > { %1894 = vmatmul.mubr.msk.f32.vlgmr.msra.gmra.mrb[6].mxu0 %vm442_vm0, %v2041_v36  ;;  %v940_v41 = vsel %vm442_vm0, %v2041_v36, 0.0 }
 0x3e0   : > { %v2043_v37 = vpop.eup %2042 }
 0x3e1   : > { %1899 = vmatmul.mubr.msk.f32.vlgmr.msra.gmra.mrb[6].mxu1 %vm442_vm0, %v2043_v37  ;;  %v2045_v39 = vpop.eup %2044  ;;  %v943_v42 = vsel %vm442_vm0, %v2043_v37, 0.0 }
 0x3e2   : > { %v2047_v40 = vpop.eup %2046  ;;  %v932_v55 = vmul.f32 %v2045_v39, %v928_v54 }
 0x3e3   : > { %971 = vperm.xlu1 %2033, %v2045_v39   ;;  %v931_v50 = vmul.f32 %v2047_v40, %v927_v48 }
 0x3e4   : > { %v2049_v43 = vpop.eup %2048 }
 0x3e5   : > { %v933_v59 = vmul.f32 %v2049_v43, %v929_v57 }
 0x3ed   : > { %966 = vperm.xlu0 %2032, %v2047_v40  }
 0x407   : > { %941 = vadd.xlane.f32.xlu1 %v940_v41 }
 0x40b   : > { %944 = vadd.xlane.f32.xlu1 %v943_v42 }
 0x41c   : > { %976 = vperm.xlu1 %2033, %v2049_v43  }
 0x45f   : > { %v936_v47 = vpop.xlane.xlu1 %935 }
 0x460   : > { %v946_v49 = vadd.f32 %v936_v47, %v930_v46 }
 0x462   : > { %951 = vst.msk [vmem:[#allocation6] sm:$0xff] %vm505_vm1, %v946_v49 }
 0x463   : > { %v972_v53 = vpop.permute.xlu1 %971 }
 0x464   : > { %v939_v51 = vpop.xlane.xlu0 %938  ;;  %v981_v11 = vmul.f32 %v972_v53, %v957_v7 }
 0x465   : > { %v947_v52 = vadd.f32 %v939_v51, %v931_v50 }
 0x467   : > { %952 = vst.msk [vmem:[#allocation6 + $0x8] sm:$0xff] %vm505_vm1, %v947_v52 }
 0x46c   : > { %v967_v2 = vpop.permute.xlu0 %966 }
 0x46d   : > { %v980_v6 = vmul.f32 %v967_v2, %v956_v0 }
 0x494   : > { %v942_v56 = vpop.xlane.xlu1 %941 }
 0x495   : > { %v948_v58 = vadd.f32 %v942_v56, %v932_v55 }
 0x497   : > { %953 = vst.msk [vmem:[#allocation6 + $0x10] sm:$0xff] %vm505_vm1, %v948_v58 }
 0x498   : > { %v945_v60 = vpop.xlane.xlu1 %944 }
 0x499   : > { %v949_v61 = vadd.f32 %v945_v60, %v933_v59 }
 0x49b   : > { %954 = vst.msk [vmem:[#allocation6 + $0x18] sm:$0xff] %vm505_vm1, %v949_v61 }
 0x49c   : > { %v977_v13 = vpop.permute.xlu1 %976 }
 0x49d   : > { %v982_v17 = vmul.f32 %v977_v13, %v958_v12 }
 0x4a4   : > { %v1052_v3 = vpop.f32.mrb[4].mxu0 }
 0x4a5   : > { %v1275_v4 = vadd.f32 %v1052_v3, %v979_v63  ;;  %v1885_v5 = vpop.f32.mrb[5].mxu0 }
 0x4a7   : > { %1279 = vst.msk [vmem:[#allocation7] sm:$0xff] %vm442_vm0, %v1275_v4 }
 0x4a9   : > { %v1125_v8 = vpop.f32.mrb[4].mxu1 }
 0x4aa   : > { %v1276_v9 = vadd.f32 %v1125_v8, %v980_v6  ;;  %v1890_v10 = vpop.f32.mrb[5].mxu1 }
 0x4ac   : > { %1280 = vst.msk [vmem:[#allocation7 + $0x8] sm:$0xff] %vm442_vm0, %v1276_v9 }
 0x4b0   : > { %v1198_v14 = vpop.f32.mrb[6].mxu0 }
 0x4b1   : > { %v1277_v15 = vadd.f32 %v1198_v14, %v981_v11  ;;  %v1895_v16 = vpop.f32.mrb[7].mxu0 }
 0x4b3   : > { %1281 = vst.msk [vmem:[#allocation7 + $0x10] sm:$0xff] %vm442_vm0, %v1277_v15 }
 0x4b4   : > { %v1271_v18 = vpop.f32.mrb[6].mxu1 }
 0x4b5   : > { %v1278_v19 = vadd.f32 %v1271_v18, %v982_v17  ;;  %v1900_v20 = vpop.f32.mrb[7].mxu1 }
 0x4b7   : > { %1282 = vst.msk [vmem:[#allocation7 + $0x18] sm:$0xff] %vm442_vm0, %v1278_v19 }
 0x4b8 PF: > { %v1292_v21 = vld [vmem:[#allocation6 + $0x10] sm:$0xff]  ;;  %v1290_v22 = vld [vmem:[#allocation6] sm:$0xff]  ;;  %v1293_v23 = vld [vmem:[#allocation6 + $0x18] sm:$0xff]  ;;  %1901 = vmatprep.subr.mxu0 %v2256_v1  ;;  %1903 = vmatprep.mubr.msk.f32.mxu0 %vm2255_vm2, %v2256_v1  ;;  %v2272_v24 = vmov 0   ;;  %s1655_s28 = sshll.u32 %s2574_s22, 4  ;;  %s2675_s19 = scalar_lea.hbm %s2733_s7, %s1798_s17  ;;  %s2677_s28 = int_to_ptr.vmem [resolvable:$true] %s1655_s28 }
 0x4b9   : > { %2051 = vset.pattern.permute.xlu1 %v2272_v24  ;;  %2050 = vset.pattern.permute.xlu0 %v2272_v24  ;;  %2052 = vrcp.f32 %v1292_v21  ;;  %v1291_v25 = vld [vmem:[#allocation6 + $0x8] sm:$0xff]  ;;  %v1326_v30 = vld [vmem:[#allocation15] sm:$0xff]  ;;  %v1327_v32 = vld [vmem:[#allocation15 + $0x8] sm:$0xff]  ;;  %s1641_s23 = scalar_lea.sflag [#allocation12], %s2502_s25  ;;  %s2158_s27 = scalar_lea.vmem %s2677_s28, 128 }
 0x4ba   : > { %2054 = vrcp.f32 %v1290_v22  ;;  %1906 = vmatprep.subr.mxu1 %v2256_v1  ;;  %1908 = vmatprep.mubr.msk.f32.mxu1 %vm2255_vm2, %v2256_v1  ;;  %v1298_v33 = vld [vmem:[#allocation7] sm:$0xff]  ;;  %v1300_v34 = vld [vmem:[#allocation7 + $0x10] sm:$0xff]  ;;  %v1299_v39 = vld [vmem:[#allocation7 + $0x8] sm:$0xff]  ;;  %p2159_p6 = scmp.ne.s32.totalorder %s2677_s28, %s2158_s27  ;;  %p2750_p1 = scmp.ne.s32.totalorder %s2746_s20, 0 }
 0x4bb   : > { %2056 = vrcp.f32 %v1293_v23  ;;  %1902 = vmatpush3.msra.mxu0 %v1326_v30  ;;  %1907 = vmatpush3.msra.mxu1 %v1327_v32  ;;  %v1328_v38 = vld [vmem:[#allocation15 + $0x10] sm:$0xff]  ;;  %v1329_v28 = vld [vmem:[#allocation15 + $0x18] sm:$0xff]  ;;  %v1816_v58 = vld [vmem:[%s2732_s6] ss:$0 sm:$0xff]  ;;  %s2273_s14 = smov [#allocation16]  }
 0x4bc   : > { %2058 = vrcp.f32 %v1291_v25  ;;  %1911 = vmatprep.subr.mxu0 %v2256_v1  ;;  %1916 = vmatprep.subr.mxu1 %v2256_v1  ;;  %p2160_p8 = pnand %p2159_p6, %p2750_p1  ;;  %s2162_s8 = sshll.u32 %s2273_s14, 4  ;;  %s2163_s8 = int_to_ptr.vmem [resolvable:$false] %s2162_s8 }
 0x4bd   : > { %s2164_s26 = scalar_lea.vmem %s2163_s8, 256  ;;  %p2165_p0 = scmp.lt.s32.totalorder %s2677_s28, %s2163_s8 }
 0x4be   : > { %v1301_v43 = vld [vmem:[#allocation7 + $0x18] sm:$0xff]  ;;  %p2161_p10 = pneg %p2160_p8  ;;  %p2166_p2 = scmp.lt.s32.totalorder %s2164_s26, %s2158_s27 }
 0x4c0   : > { %p2167_p5 = por %p2166_p2, %p2165_p0 }
 0x4c2   : > { %p2168_p9 = pnand %p2167_p5, %p2161_p10 }
 0x4c3   : > { %v2053_v26 = vpop.eup %2052 }
 0x4c4   : > { %v2055_v27 = vpop.eup %2054  ;;  %1314 = vperm.xlu1 %2051, %v2053_v26  }
 0x4c5   : > { %v2057_v29 = vpop.eup %2056  ;;  %1304 = vperm.xlu0 %2050, %v2055_v27  }
 0x4c6   : > { %v2059_v31 = vpop.eup %2058 }
 0x4c8   : > { %1319 = vperm.xlu1 %2051, %v2057_v29  }
 0x4c9   : > { %1309 = vperm.xlu0 %2050, %v2059_v31  }
 0x543   : > { %v1315_v35 = vpop.permute.xlu1 %1314 }
 0x544   : > { %v1305_v36 = vpop.permute.xlu0 %1304  ;;  %v1324_v40 = vmul.f32 %v1315_v35, %v1300_v34 }
 0x545   : > { %v1322_v37 = vmul.f32 %v1305_v36, %v1298_v33 }
 0x547   : > { %1904 = vmatmul.mubr.msk.f32.vlgmr.msra.gmra.mrb[0].mxu0 %vm442_vm0, %v1322_v37  ;;  %v1320_v44 = vpop.permute.xlu1 %1319 }
 0x548   : > { %v1310_v41 = vpop.permute.xlu0 %1309  ;;  %1912 = vmatpush3.msra.mxu0 %v1328_v38  ;;  %1913 = vmatprep.mubr.msk.f32.mxu0 %vm2255_vm2, %v2256_v1  ;;  %v1325_v45 = vmul.f32 %v1320_v44, %v1301_v43 }
 0x549   : > { %v1323_v42 = vmul.f32 %v1310_v41, %v1299_v39 }
 0x54b   : > { %1909 = vmatmul.mubr.msk.f32.vlgmr.msra.gmra.mrb[0].mxu1 %vm442_vm0, %v1323_v42  ;;  %1914 = vmatmul.mubr.msk.f32.vlgmr.msra.gmra.mrb[2].mxu0 %vm442_vm0, %v1324_v40 }
 0x54c   : > { %1917 = vmatpush3.msra.mxu1 %v1329_v28  ;;  %1918 = vmatprep.mubr.msk.f32.mxu1 %vm2255_vm2, %v2256_v1 }
 0x54f   : > { %1919 = vmatmul.mubr.msk.f32.vlgmr.msra.gmra.mrb[2].mxu1 %vm442_vm0, %v1325_v45 }
 0x61a   : > { %v1400_v46 = vpop.f32.mrb[0].mxu0 }
 0x61b   : > { %v1905_v47 = vpop.f32.mrb[1].mxu0  ;;  %v1624_v50 = vsel %vm367_vm3, %v1400_v46, 0.0 }
 0x61e   : > { %v1473_v48 = vpop.f32.mrb[0].mxu1  ;;  %v1546_v49 = vpop.f32.mrb[2].mxu0 }
 0x61f   : > { %v1625_v51 = vsel %vm367_vm3, %v1473_v48, 0.0  ;;  %v1910_v52 = vpop.f32.mrb[1].mxu1  ;;  %v1915_v53 = vpop.f32.mrb[3].mxu0  ;;  %v1627_v1 = vsel %vm367_vm3, %v1546_v49, 0.0 }
 0x620   : > { %v1626_v54 = vadd.f32 %v1625_v51, %v1624_v50 }
 0x622   : > { %v1628_v55 = vadd.f32 %v1627_v1, %v1626_v54  ;;  %v1619_v56 = vpop.f32.mrb[2].mxu1 }
 0x623   : > { %v1629_v57 = vsel %vm367_vm3, %v1619_v56, 0.0  ;;  %v1920_v59 = vpop.f32.mrb[3].mxu1 }
 0x624   : > { %v1630_v60 = vadd.f32 %v1629_v57, %v1628_v55 }
 0x626   : > { %v1638_v61 = vadd.f32 %v1816_v58, %v1630_v60 }
 0x628   : > { %1639 = vst.msk [vmem:[%s2574_s22] sm:$0xff] %vm367_vm3, %v1638_v61 }
 0x629   : > { %2171 = shalt.err (!%p2168_p9)
}
 0x62a   : > { %s2172_s25 = scalar_lea.hbm %s2675_s19, 128  ;;  %s2176_s18 = scalar_lea.hbm %s2733_s7, 256 }
 0x62b   : > { %p2173_p4 = scmp.ne.s32.totalorder %s2675_s19, %s2172_s25  ;;  %p2177_p7 = scmp.lt.u32.totalorder %s2675_s19, %s2733_s7 }
 0x62c   : > { %p2178_p13 = scmp.lt.u32.totalorder %s2176_s18, %s2172_s25  ;;  %p2180_p6 = scmp.lt.u32.totalorder %s2172_s25, %s2675_s19 }
 0x62d   : > { %p2174_p11 = pnand %p2173_p4, %p2750_p1 }
 0x62e   : > { %p2179_p3 = por %p2178_p13, %p2177_p7 }
 0x62f   : > { %p2175_p12 = pneg %p2174_p11 }
 0x630   : > { %p2181_p8 = por %p2180_p6, %p2179_p3 }
 0x632   : > { %p2182_p10 = pnand %p2181_p8, %p2175_p12 }
 0x634   : > { %2185 = shalt.err (!%p2182_p10)
}
 0x635   : > { %1937 = dma.vmem_to_hbm [thread:$0]  (%p2750_p1), %s2677_s28, 128, %s2675_s19, %s1641_s23  }
 0x636 PF: > { %s2751_s16 = sld [smem:[#allocation21_spill]]  ;;  %s1667_s11 = sand.u32 1, %s2226_s29  }
 0x637   : > { %p2753_p2 = scmp.ge.s32.totalorder %s2246_s10, 2  ;;  %s1668_s15 = scalar_lea.sflag [#allocation12], %s1667_s11 }
 0x63c   : > { %p2752_p0 = scmp.ne.s32.totalorder %s2751_s16, 0 }
 0x63e   : > { %p1951_p5 = pnand %p2753_p2, %p2752_p0 }
 0x640   : > { %2221 = dma.done.wait (!%p1951_p5), %s1668_s15, 128  }
 0x641   : > { %2223 = vsyncadd (!%p1951_p5), %s1668_s15, 4294967168  ;;  %s30_s10 = sadd.s32 1, %s2246_s10   ;;  %s2754_s29 = smov %s2230_s0 }
 0x642   : > { %p27_p9 = scmp.ge.s32.totalorder %s30_s10, 4   ;;  %s2755_s0 = smov %s2234_s30 }
 0x643   : > { %s2756_s30 = smov %s2459_s21  ;;  %s2757_s8 = smov %s2242_s9 }
 0x644   : > { %s2758_s9 = smov %s2760_s24  ;;  %29 = sbr.rel (!%p27_p9) target bundleno = 22 (0x16), region = 128 }
 0x64b   :  { %1673 = vsyncpa [#allocation11], 1 }
 0x64c   :  { %1675 = vsyncpa [#allocation11 + $0x1], 1 }
 0x64d   :  { %1676 = vsyncpa [#allocation14], 1 }
 0x64e   :  { %1677 = vsyncpa [#allocation12], 1 }
 0x64f   :  { %1679 = vsyncpa [#allocation12 + $0x1], 1 }

</bundles_post_ra>
